<compile_context>
chip_gen: v6e
topology: v6e:2x2x1
jax: 0.10.0
libtpu: 0.0.40
codegen_flags: <defaults>
</compile_context>

<pallas_src>
import functools

import jax
import jax.numpy as jnp
from jax.experimental import pallas as pl
from jax.experimental.pallas import tpu as pltpu

_EPS = 1e-5  # PyTorch GroupNorm default eps


# ---------------------------------------------------------------------------
# math helpers
# ---------------------------------------------------------------------------
def _erf_ref(z):
    # Abramowitz & Stegun 7.1.26 polynomial (|err| < 1.5e-7): matches
    # PyTorch's exact-erf nn.GELU() to fp32 test precision.
    a1, a2, a3, a4, a5 = 0.254829592, -0.284496736, 1.421413741, -1.453152027, 1.061405429
    p = 0.3275911
    s = jnp.where(z >= 0.0, 1.0, -1.0)
    az = jnp.abs(z)
    t = 1.0 / (1.0 + p * az)
    poly = ((((a5 * t + a4) * t + a3) * t + a2) * t + a1) * t
    return s * (1.0 - poly * jnp.exp(-az * az))


def _gelu_ref(v):
    return 0.5 * v * (1.0 + _erf_ref(v * 0.7071067811865476))


def _gelu_kernel(v):
    # Same polynomial, but the reciprocal rides the EUP slot (approx rcp);
    # exp already lowers to the EUP. Error is scaled by layer_scale=1e-5 at the
    # output so it is far below test tolerance.
    s = jnp.where(v >= 0.0, 1.0, -1.0)
    az = jnp.abs(v) * 0.7071067811865476
    t = pl.reciprocal(1.0 + 0.3275911 * az, approx=True)
    poly = ((((1.061405429 * t - 1.453152027) * t + 1.421413741) * t
             - 0.284496736) * t + 0.254829592) * t
    erf = s * (1.0 - poly * jnp.exp(-az * az))
    return 0.5 * v * (1.0 + erf)


# ---------------------------------------------------------------------------
# pure-JAX reference (NCHW, independent of the kernel's layout/pool strategy)
# ---------------------------------------------------------------------------
def _group_norm1_ref(v, gamma, beta):
    mean = jnp.mean(v)
    var = jnp.mean((v - mean) ** 2)
    return (v - mean) * jax.lax.rsqrt(var + _EPS) * gamma + beta


def _shift2d_ref(v, dy, dx):
    C, H, W = v.shape
    if dy > 0:
        v = jnp.concatenate([v[:, dy:, :], jnp.zeros((C, dy, W), v.dtype)], axis=1)
    elif dy < 0:
        v = jnp.concatenate([jnp.zeros((C, -dy, W), v.dtype), v[:, :dy, :]], axis=1)
    if dx > 0:
        v = jnp.concatenate([v[:, :, dx:], jnp.zeros((C, H, dx), v.dtype)], axis=2)
    elif dx < 0:
        v = jnp.concatenate([jnp.zeros((C, H, -dx), v.dtype), v[:, :, :dx]], axis=2)
    return v


def _pool_minus_x_ref(v):
    C, H, W = v.shape
    row = jax.lax.broadcasted_iota(jnp.int32, (C, H, W), 1)
    col = jax.lax.broadcasted_iota(jnp.int32, (C, H, W), 2)
    acc = jnp.zeros((C, H, W), jnp.float32)
    cnt = jnp.zeros((C, H, W), jnp.float32)
    for dy in (-1, 0, 1):
        for dx in (-1, 0, 1):
            acc = acc + _shift2d_ref(v, dy, dx)
            valid = ((row + dy >= 0) & (row + dy < H) &
                     (col + dx >= 0) & (col + dx < W))
            cnt = cnt + valid.astype(jnp.float32)
    return acc / cnt - v


def _block_single_ref(x, g1, b1, g2, b2, ls1, ls2, w1, bb1, w2, bb2):
    C, H, W = x.shape
    xn1 = _group_norm1_ref(x, g1, b1)
    x1 = x + ls1 * _pool_minus_x_ref(xn1)
    xn2 = _group_norm1_ref(x1, g2, b2)
    xf = xn2.reshape(C, H * W)
    h = jnp.dot(w1, xf, preferred_element_type=jnp.float32) + bb1
    h = _gelu_ref(h)
    out = jnp.dot(w2, h, preferred_element_type=jnp.float32) + bb2
    return x1 + ls2 * out.reshape(C, H, W)


# ---------------------------------------------------------------------------
# Pallas kernel (lane-dense (C, HWp) working layout; HWp = 128-aligned H*W)
# ---------------------------------------------------------------------------
def _poolformer_kernel(x_ref, cp_ref, aux_ref, w1_ref, bb1_ref, w2_ref, bb2_ref,
                       o_ref, xn2_buf, *, W, HW, HWp, bt):
    C = cp_ref.shape[0]
    inv_n = 1.0 / float(C * HW)            # statistics over VALID lanes only
    pad_total = float(C * (HWp - HW))

    # packed per-channel params -> (C, 1) columns (lane-broadcast over (C, HWp))
    g1 = cp_ref[:, 0:1]
    b1 = cp_ref[:, 1:2]
    g2 = cp_ref[:, 2:3]
    b2 = cp_ref[:, 3:4]
    ls1 = cp_ref[:, 4:5]
    ls2 = cp_ref[:, 5:6]

    # precomputed spatial planes (1, HWp): boundary masks, reciprocal pool
    # counts (count_include_pad=False; zero on pad lanes), valid-lane mask.
    m_jp = aux_ref[0:1, :]
    m_jm = aux_ref[1:2, :]
    m_ip = aux_ref[2:3, :]
    m_im = aux_ref[3:4, :]
    inv_cnt = aux_ref[4:5, :]
    valid = aux_ref[5:6, :]

    w1 = w1_ref[...]          # bf16, cast in the wrapper
    w2 = w2_ref[...]          # bf16
    bb1 = bb1_ref[...]        # f32 (Dh, 1)
    bb2 = bb2_ref[...]        # f32 (C, 1)

    def gnorm(v, gamma, beta):
        # GroupNorm(num_groups=1): two-pass stats over all valid (C, HW)
        # elements; pad lanes of v are exactly zero, so the pad contribution
        # to sum((v-mean)^2) is pad_total*mean^2 and is subtracted exactly.
        mean = jnp.sum(v) * inv_n
        d = v - mean
        ssd = jnp.sum(d * d) - pad_total * (mean * mean)
        var = ssd * inv_n
        gscale = gamma * jax.lax.rsqrt(var + _EPS)      # fold affine: 1 mul
        return d * gscale + beta                        # + 1 FMA over (C, HWp)

    def pool_minus(v):
        # separable 3x3 avg pool (stride 1, pad 1, count_include_pad=False) - v
        # in flattened (C, HWp) layout: lane rolls (XLU) + boundary masks.
        xr = pltpu.roll(v, (-1) % HWp, axis=1) * m_jp    # reads (i, j+1)
        xl = pltpu.roll(v, 1 % HWp, axis=1) * m_jm       # reads (i, j-1)
        row = v + xr + xl
        rd = pltpu.roll(row, (-W) % HWp, axis=1) * m_ip  # reads row i+1
        ru = pltpu.roll(row, W % HWp, axis=1) * m_im     # reads row i-1
        return (row + rd + ru) * inv_cnt - v

    # ---- phase 1: per-sample VPU/XLU work. Intermediates are flushed to VMEM
    # (o_ref / xn2_buf) every iteration, so the static loop carries no large
    # live ranges; all MXU work is hoisted out of the loop.
    for bi in range(bt):
        x = x_ref[bi]                                    # (C, HWp) f32
        xn1 = gnorm(x, g1, b1)
        if HWp != HW:
            xn1 = xn1 * valid        # keep pad lanes exactly zero -> x1 pad = 0
        x1 = x + ls1 * pool_minus(xn1)                   # drop_path == Identity
        o_ref[bi] = x1                                   # stash residual
        xn2_buf[:, bi * HWp:(bi + 1) * HWp] = gnorm(x1, g2, b2)

    # ---- phase 2: one fc1 / GELU / fc2 over the packed (C, bt*HWp) lane axis
    # (1x1 convs == matmuls over C; dropout = 0). bf16 MXU operands, f32 acc.
    h = jnp.dot(w1, xn2_buf[...].astype(jnp.bfloat16),
                preferred_element_type=jnp.float32) + bb1
    h = _gelu_kernel(h)
    mlp = jnp.dot(w2, h.astype(jnp.bfloat16),
                  preferred_element_type=jnp.float32) + bb2

    # ---- phase 3: layer-scale residual
    for bi in range(bt):
        o_ref[bi] = o_ref[bi] + ls2 * mlp[:, bi * HWp:(bi + 1) * HWp]


# ---------------------------------------------------------------------------
# wrapper helpers
# ---------------------------------------------------------------------------
def _pool_aux(H, W, HWp):
    """(6, HWp) f32: 4 boundary masks, reciprocal valid-neighbour count, valid
    lane mask. Pad lanes are zero in every plane."""
    f32 = jnp.float32
    HW = H * W
    j = jnp.arange(W)
    i = jnp.arange(H)
    m_jp = (j < W - 1).astype(f32)
    m_jm = (j > 0).astype(f32)
    m_ip = (i < H - 1).astype(f32)
    m_im = (i > 0).astype(f32)
    ones_h = jnp.ones((H,), f32)
    ones_w = jnp.ones((W,), f32)
    cnt = (1.0 + m_ip + m_im)[:, None] * (1.0 + m_jp + m_jm)[None, :]
    planes = jnp.stack([
        (ones_h[:, None] * m_jp[None, :]).reshape(HW),
        (ones_h[:, None] * m_jm[None, :]).reshape(HW),
        (m_ip[:, None] * ones_w[None, :]).reshape(HW),
        (m_im[:, None] * ones_w[None, :]).reshape(HW),
        (1.0 / cnt).reshape(HW),
        jnp.ones((HW,), f32),
    ], axis=0)
    if HWp > HW:
        planes = jnp.pad(planes, ((0, 0), (0, HWp - HW)))
    return planes


def _vmem_limit_bytes():
    # Per-generation VMEM budget (v5e/v6e: 128 MiB physical, v7x: 64 MiB).
    cap = 64 << 20
    try:
        info = pltpu.get_tpu_info()
        cap = int(getattr(info, "vmem_capacity_bytes", cap) or cap)
    except Exception:
        pass
    return int(min(64 << 20, max(32 << 20, cap // 2)))


def _choose_block_b(B, C, HWp, Dh, vmem_limit):
    # rough per-sample VMEM footprint: double-buffered in/out blocks, the
    # packed xn2 scratch, the (Dh, HWp) hidden tensor and a few intermediates.
    per_sample = max(16 * C * HWp * 4, 1)
    weight_bytes = 2 * (Dh * C * 2) + 6 * HWp * 4 + 1024
    budget = max(int(vmem_limit * 0.6) - weight_bytes, per_sample)
    bt = int(max(1, min(B, 8, budget // per_sample)))
    if B >= 2:
        bt = max(1, min(bt, B // 2))   # >=2 grid steps so v7x's 2 TCs get work
    while B % bt:
        bt -= 1
    return bt


def _buffered_supported():
    try:
        pl.BlockSpec((8, 128), lambda b: (0, 0), pipeline_mode=pl.Buffered(1))
        return True
    except Exception:
        return False


_BUFFERED_OK = _buffered_supported()


# ---------------------------------------------------------------------------
# wrapper
# ---------------------------------------------------------------------------
def poolformer_block(x, params, block_b=None):
    B, C, H, W = x.shape
    HW = H * W
    HWp = ((HW + 127) // 128) * 128           # lane-dense, 128-aligned
    Dh = params["w1"].shape[0]
    f32 = jnp.float32

    vmem_limit = _vmem_limit_bytes()
    if block_b is None:
        block_b = _choose_block_b(B, C, HWp, Dh, vmem_limit)
    assert B % block_b == 0

    # lane-dense layouts, built wrapper-side (pad lanes are zero)
    xf = x.reshape(B, C, HW).astype(f32)
    if HWp > HW:
        xf = jnp.pad(xf, ((0, 0), (0, 0), (0, HWp - HW)))
    cp = jnp.concatenate(
        [params[k].reshape(C, 1).astype(f32)
         for k in ("g1", "b1", "g2", "b2", "ls1", "ls2")], axis=1)      # (C, 6)
    aux = _pool_aux(H, W, HWp)                                          # (6, HWp)
    w1 = params["w1"].astype(jnp.bfloat16)                              # (Dh, C)
    bb1 = params["bb1"].reshape(Dh, 1).astype(f32)
    w2 = params["w2"].astype(jnp.bfloat16)                              # (C, Dh)
    bb2 = params["bb2"].reshape(C, 1).astype(f32)

    kernel = functools.partial(_poolformer_kernel, W=W, HW=HW, HWp=HWp, bt=block_b)

    def run(single_buffer):
        def const_spec(shape):
            n = len(shape)
            if single_buffer:
                # grid-invariant block: fetch once, don't double-buffer.
                return pl.BlockSpec(shape, lambda b: (0,) * n,
                                    pipeline_mode=pl.Buffered(1))
            return pl.BlockSpec(shape, lambda b: (0,) * n)

        return pl.pallas_call(
            kernel,
            out_shape=jax.ShapeDtypeStruct((B, C, HWp), f32),
            grid_spec=pltpu.PrefetchScalarGridSpec(
                num_scalar_prefetch=0,
                grid=(B // block_b,),
                in_specs=[
                    pl.BlockSpec((block_b, C, HWp), lambda b: (b, 0, 0)),  # x
                    const_spec((C, 6)),      # packed channel params
                    const_spec((6, HWp)),    # pool masks + inv count + valid
                    const_spec((Dh, C)),     # fc1 weight (bf16)
                    const_spec((Dh, 1)),     # fc1 bias
                    const_spec((C, Dh)),     # fc2 weight (bf16)
                    const_spec((C, 1)),      # fc2 bias
                ],
                out_specs=pl.BlockSpec((block_b, C, HWp), lambda b: (b, 0, 0)),
                scratch_shapes=[pltpu.VMEM((C, block_b * HWp), f32)],   # xn2 pack
            ),
            compiler_params=pltpu.CompilerParams(
                dimension_semantics=("parallel",),
                vmem_limit_bytes=vmem_limit,
            ),
        )(xf, cp, aux, w1, bb1, w2, bb2)

    if _BUFFERED_OK:
        try:
            out = run(True)
        except Exception:
            out = run(False)
    else:
        out = run(False)

    return out[:, :, :HW].reshape(B, C, H, W)


# ---------------------------------------------------------------------------
# deterministic parameter init (synthetic; shapes follow the module __init__)
# ---------------------------------------------------------------------------
def init_params(key, dim, mlp_ratio=4.0, layer_scale_init_value=1e-5):
    dh = int(dim * mlp_ratio)
    ks = jax.random.split(key, 8)
    f32 = jnp.float32
    return {
        "g1": 1.0 + 0.1 * jax.random.normal(ks[0], (dim, 1, 1), f32),
        "b1": 0.1 * jax.random.normal(ks[1], (dim, 1, 1), f32),
        "g2": 1.0 + 0.1 * jax.random.normal(ks[2], (dim, 1, 1), f32),
        "b2": 0.1 * jax.random.normal(ks[3], (dim, 1, 1), f32),
        "ls1": jnp.full((dim, 1, 1), layer_scale_init_value, f32),
        "ls2": jnp.full((dim, 1, 1), layer_scale_init_value, f32),
        "w1": 0.2 * jax.random.normal(ks[4], (dh, dim), f32),
        "bb1": 0.1 * jax.random.normal(ks[5], (dh, 1), f32),
        "w2": 0.2 * jax.random.normal(ks[6], (dim, dh), f32),
        "bb2": 0.1 * jax.random.normal(ks[7], (dim, 1), f32),
    }


if __name__ == "__main__":
    key = jax.random.PRNGKey(0)
    kx, kp, kx2 = jax.random.split(key, 3)

    # TODO(synk): the repo's custom Mlp also returns a `token_mask` that the
    # block only stores in a python list; its source is unavailable so only
    # the output tensor path is implemented.
    def ref_fn(params):
        return jax.vmap(lambda xi: _block_single_ref(
            xi, params["g1"], params["b1"], params["g2"], params["b2"],
            params["ls1"], params["ls2"], params["w1"], params["bb1"],
            params["w2"], params["bb2"]))

    # --- test 1: 128-aligned spatial size (no lane padding), grid = 2 steps ---
    B, C, H, W = 2, 4, 16, 16          # dim=4, pool_size=3, mlp_ratio=4 -> hidden=16
    x = jax.random.normal(kx, (B, C, H, W), jnp.float32)
    params = init_params(kp, C)
    out = jax.block_until_ready(poolformer_block(x, params))
    ref = ref_fn(params)(x)
    assert out.shape == (B, C, H, W) and out.dtype == jnp.float32
    err1 = float(jnp.max(jnp.abs(out - ref)))
    assert jnp.allclose(out, ref, atol=5e-5, rtol=1e-5), err1

    # --- test 2: non-128-multiple spatial size (HW=196 -> padded to 256) and
    # block_b=2 (packed (C, 2*HWp) matmul path) ---
    B2, H2, W2 = 4, 14, 14
    x2 = jax.random.normal(kx2, (B2, C, H2, W2), jnp.float32)
    out2 = jax.block_until_ready(poolformer_block(x2, params))
    ref2 = ref_fn(params)(x2)
    assert out2.shape == (B2, C, H2, W2)
    err2 = float(jnp.max(jnp.abs(out2 - ref2)))
    assert jnp.allclose(out2, ref2, atol=5e-5, rtol=1e-5), err2

    print("KERNEL_OK")
</pallas_src>

<mosaic_0001>
module attributes {stable_mosaic.version = 11 : i64} {
  func.func @_poolformer_kernel(%arg0: i32, %arg1: memref<1x4x256xf32, #tpu.memory_space<vmem>>, %arg2: memref<4x6xf32, #tpu.memory_space<vmem>>, %arg3: memref<6x256xf32, #tpu.memory_space<vmem>>, %arg4: memref<16x4xbf16, #tpu.memory_space<vmem>>, %arg5: memref<16x1xf32, #tpu.memory_space<vmem>>, %arg6: memref<4x16xbf16, #tpu.memory_space<vmem>>, %arg7: memref<4x1xf32, #tpu.memory_space<vmem>>, %arg8: memref<1x4x256xf32, #tpu.memory_space<vmem>>, %arg9: memref<4x256xf32, #tpu.memory_space<vmem>>) attributes {dimension_semantics = [#tpu.dimension_semantics<parallel>], iteration_bounds = array<i64: 2>, scalar_prefetch = 0 : i64, scratch_operands = 1 : i64, tpu.core_type = #tpu.core_type<tc>, window_params = [{transform_indices = @transform_0, window_bounds = array<i64: 1, 4, 256>}, {pipeline_mode = #tpu.pipeline_mode<synchronous>, transform_indices = @transform_1, window_bounds = array<i64: 4, 6>}, {pipeline_mode = #tpu.pipeline_mode<synchronous>, transform_indices = @transform_2, window_bounds = array<i64: 6, 256>}, {pipeline_mode = #tpu.pipeline_mode<synchronous>, transform_indices = @transform_3, window_bounds = array<i64: 16, 4>}, {pipeline_mode = #tpu.pipeline_mode<synchronous>, transform_indices = @transform_4, window_bounds = array<i64: 16, 1>}, {pipeline_mode = #tpu.pipeline_mode<synchronous>, transform_indices = @transform_5, window_bounds = array<i64: 4, 16>}, {pipeline_mode = #tpu.pipeline_mode<synchronous>, transform_indices = @transform_6, window_bounds = array<i64: 4, 1>}, {transform_indices = @transform_7, window_bounds = array<i64: 1, 4, 256>}]} {
    %c0 = arith.constant 0 : index
    %c0_0 = arith.constant 0 : index
    %0 = vector.load %arg2[%c0, %c0_0] : memref<4x6xf32, #tpu.memory_space<vmem>>, vector<4x1xf32>
    %c0_1 = arith.constant 0 : index
    %c1 = arith.constant 1 : index
    %1 = vector.load %arg2[%c0_1, %c1] : memref<4x6xf32, #tpu.memory_space<vmem>>, vector<4x1xf32>
    %c0_2 = arith.constant 0 : index
    %c2 = arith.constant 2 : index
    %2 = vector.load %arg2[%c0_2, %c2] : memref<4x6xf32, #tpu.memory_space<vmem>>, vector<4x1xf32>
    %c0_3 = arith.constant 0 : index
    %c3 = arith.constant 3 : index
    %3 = vector.load %arg2[%c0_3, %c3] : memref<4x6xf32, #tpu.memory_space<vmem>>, vector<4x1xf32>
    %c0_4 = arith.constant 0 : index
    %c4 = arith.constant 4 : index
    %4 = vector.load %arg2[%c0_4, %c4] : memref<4x6xf32, #tpu.memory_space<vmem>>, vector<4x1xf32>
    %c0_5 = arith.constant 0 : index
    %c5 = arith.constant 5 : index
    %5 = vector.load %arg2[%c0_5, %c5] : memref<4x6xf32, #tpu.memory_space<vmem>>, vector<4x1xf32>
    %c0_6 = arith.constant 0 : index
    %c0_7 = arith.constant 0 : index
    %6 = vector.load %arg3[%c0_6, %c0_7] : memref<6x256xf32, #tpu.memory_space<vmem>>, vector<1x256xf32>
    %c1_8 = arith.constant 1 : index
    %c0_9 = arith.constant 0 : index
    %7 = vector.load %arg3[%c1_8, %c0_9] : memref<6x256xf32, #tpu.memory_space<vmem>>, vector<1x256xf32>
    %c2_10 = arith.constant 2 : index
    %c0_11 = arith.constant 0 : index
    %8 = vector.load %arg3[%c2_10, %c0_11] : memref<6x256xf32, #tpu.memory_space<vmem>>, vector<1x256xf32>
    %c3_12 = arith.constant 3 : index
    %c0_13 = arith.constant 0 : index
    %9 = vector.load %arg3[%c3_12, %c0_13] : memref<6x256xf32, #tpu.memory_space<vmem>>, vector<1x256xf32>
    %c4_14 = arith.constant 4 : index
    %c0_15 = arith.constant 0 : index
    %10 = vector.load %arg3[%c4_14, %c0_15] : memref<6x256xf32, #tpu.memory_space<vmem>>, vector<1x256xf32>
    %c0_16 = arith.constant 0 : index
    %c0_17 = arith.constant 0 : index
    %11 = vector.load %arg4[%c0_16, %c0_17] : memref<16x4xbf16, #tpu.memory_space<vmem>>, vector<16x4xbf16>
    %c0_18 = arith.constant 0 : index
    %c0_19 = arith.constant 0 : index
    %12 = vector.load %arg6[%c0_18, %c0_19] : memref<4x16xbf16, #tpu.memory_space<vmem>>, vector<4x16xbf16>
    %c0_20 = arith.constant 0 : index
    %c0_21 = arith.constant 0 : index
    %13 = vector.load %arg5[%c0_20, %c0_21] : memref<16x1xf32, #tpu.memory_space<vmem>>, vector<16x1xf32>
    %c0_22 = arith.constant 0 : index
    %c0_23 = arith.constant 0 : index
    %14 = vector.load %arg7[%c0_22, %c0_23] : memref<4x1xf32, #tpu.memory_space<vmem>>, vector<4x1xf32>
    %c0_24 = arith.constant 0 : index
    %c0_25 = arith.constant 0 : index
    %c0_26 = arith.constant 0 : index
    %15 = vector.load %arg1[%c0_24, %c0_25, %c0_26] : memref<1x4x256xf32, #tpu.memory_space<vmem>>, vector<1x4x256xf32>
    %16 = vector.shape_cast %15 : vector<1x4x256xf32> to vector<4x256xf32>
    %17 = vector.shape_cast %16 : vector<4x256xf32> to vector<1x4x256xf32>
    %cst = arith.constant dense<0.000000e+00> : vector<1xf32>
    %18 = vector.multi_reduction <add>, %17, %cst [1, 2] : vector<1x4x256xf32> to vector<1xf32>
    %19 = vector.shape_cast %18 : vector<1xf32> to vector<1x1x1xf32>
    %20 = vector.extract %19[0, 0, 0] : f32 from vector<1x1x1xf32>
    %cst_27 = arith.constant 9.765625E-4 : f32
    %21 = arith.mulf %20, %cst_27 : f32
    %22 = vector.broadcast %21 : f32 to vector<4x256xf32>
    %23 = arith.subf %16, %22 : vector<4x256xf32>
    %24 = arith.mulf %23, %23 : vector<4x256xf32>
    %25 = vector.shape_cast %24 : vector<4x256xf32> to vector<1x4x256xf32>
    %cst_28 = arith.constant dense<0.000000e+00> : vector<1xf32>
    %26 = vector.multi_reduction <add>, %25, %cst_28 [1, 2] : vector<1x4x256xf32> to vector<1xf32>
    %27 = vector.shape_cast %26 : vector<1xf32> to vector<1x1x1xf32>
    %28 = vector.extract %27[0, 0, 0] : f32 from vector<1x1x1xf32>
    %29 = arith.mulf %21, %21 : f32
    %cst_29 = arith.constant 0.000000e+00 : f32
    %30 = arith.mulf %cst_29, %29 : f32
    %31 = arith.subf %28, %30 : f32
    %cst_30 = arith.constant 9.765625E-4 : f32
    %32 = arith.mulf %31, %cst_30 : f32
    %cst_31 = arith.constant 9.99999974E-6 : f32
    %33 = arith.addf %32, %cst_31 : f32
    %34 = math.rsqrt %33 : f32
    %35 = vector.broadcast %34 : f32 to vector<4x1xf32>
    %36 = arith.mulf %0, %35 : vector<4x1xf32>
    %37 = vector.broadcast %36 : vector<4x1xf32> to vector<4x256xf32>
    %38 = arith.mulf %23, %37 : vector<4x256xf32>
    %39 = vector.broadcast %1 : vector<4x1xf32> to vector<4x256xf32>
    %40 = arith.addf %38, %39 : vector<4x256xf32>
    %c255_i32 = arith.constant 255 : i32
    %41 = tpu.dynamic_rotate %40 by %c255_i32 dim 1 : vector<4x256xf32>, i32 -> vector<4x256xf32>
    %42 = vector.broadcast %6 : vector<1x256xf32> to vector<4x256xf32>
    %43 = arith.mulf %41, %42 : vector<4x256xf32>
    %c1_i32 = arith.constant 1 : i32
    %44 = tpu.dynamic_rotate %40 by %c1_i32 dim 1 : vector<4x256xf32>, i32 -> vector<4x256xf32>
    %45 = vector.broadcast %7 : vector<1x256xf32> to vector<4x256xf32>
    %46 = arith.mulf %44, %45 : vector<4x256xf32>
    %47 = arith.addf %40, %43 : vector<4x256xf32>
    %48 = arith.addf %47, %46 : vector<4x256xf32>
    %c240_i32 = arith.constant 240 : i32
    %49 = tpu.dynamic_rotate %48 by %c240_i32 dim 1 : vector<4x256xf32>, i32 -> vector<4x256xf32>
    %50 = vector.broadcast %8 : vector<1x256xf32> to vector<4x256xf32>
    %51 = arith.mulf %49, %50 : vector<4x256xf32>
    %c16_i32 = arith.constant 16 : i32
    %52 = tpu.dynamic_rotate %48 by %c16_i32 dim 1 : vector<4x256xf32>, i32 -> vector<4x256xf32>
    %53 = vector.broadcast %9 : vector<1x256xf32> to vector<4x256xf32>
    %54 = arith.mulf %52, %53 : vector<4x256xf32>
    %55 = arith.addf %48, %51 : vector<4x256xf32>
    %56 = arith.addf %55, %54 : vector<4x256xf32>
    %57 = vector.broadcast %10 : vector<1x256xf32> to vector<4x256xf32>
    %58 = arith.mulf %56, %57 : vector<4x256xf32>
    %59 = arith.subf %58, %40 : vector<4x256xf32>
    %60 = vector.broadcast %4 : vector<4x1xf32> to vector<4x256xf32>
    %61 = arith.mulf %60, %59 : vector<4x256xf32>
    %62 = arith.addf %16, %61 : vector<4x256xf32>
    %c0_32 = arith.constant 0 : index
    %c0_33 = arith.constant 0 : index
    %c0_34 = arith.constant 0 : index
    %63 = vector.load %arg8[%c0_32, %c0_33, %c0_34] : memref<1x4x256xf32, #tpu.memory_space<vmem>>, vector<1x4x256xf32>
    %64 = vector.shape_cast %63 : vector<1x4x256xf32> to vector<4x256xf32>
    %65 = vector.shape_cast %62 : vector<4x256xf32> to vector<1x4x256xf32>
    tpu.vector_store %arg8[%c0_32, %c0_33, %c0_34], %65 {strides = array<i32>} : memref<1x4x256xf32, #tpu.memory_space<vmem>>, vector<1x4x256xf32>,
    %66 = vector.shape_cast %62 : vector<4x256xf32> to vector<1x4x256xf32>
    %cst_35 = arith.constant dense<0.000000e+00> : vector<1xf32>
    %67 = vector.multi_reduction <add>, %66, %cst_35 [1, 2] : vector<1x4x256xf32> to vector<1xf32>
    %68 = vector.shape_cast %67 : vector<1xf32> to vector<1x1x1xf32>
    %69 = vector.extract %68[0, 0, 0] : f32 from vector<1x1x1xf32>
    %cst_36 = arith.constant 9.765625E-4 : f32
    %70 = arith.mulf %69, %cst_36 : f32
    %71 = vector.broadcast %70 : f32 to vector<4x256xf32>
    %72 = arith.subf %62, %71 : vector<4x256xf32>
    %73 = arith.mulf %72, %72 : vector<4x256xf32>
    %74 = vector.shape_cast %73 : vector<4x256xf32> to vector<1x4x256xf32>
    %cst_37 = arith.constant dense<0.000000e+00> : vector<1xf32>
    %75 = vector.multi_reduction <add>, %74, %cst_37 [1, 2] : vector<1x4x256xf32> to vector<1xf32>
    %76 = vector.shape_cast %75 : vector<1xf32> to vector<1x1x1xf32>
    %77 = vector.extract %76[0, 0, 0] : f32 from vector<1x1x1xf32>
    %78 = arith.mulf %70, %70 : f32
    %cst_38 = arith.constant 0.000000e+00 : f32
    %79 = arith.mulf %cst_38, %78 : f32
    %80 = arith.subf %77, %79 : f32
    %cst_39 = arith.constant 9.765625E-4 : f32
    %81 = arith.mulf %80, %cst_39 : f32
    %cst_40 = arith.constant 9.99999974E-6 : f32
    %82 = arith.addf %81, %cst_40 : f32
    %83 = math.rsqrt %82 : f32
    %84 = vector.broadcast %83 : f32 to vector<4x1xf32>
    %85 = arith.mulf %2, %84 : vector<4x1xf32>
    %86 = vector.broadcast %85 : vector<4x1xf32> to vector<4x256xf32>
    %87 = arith.mulf %72, %86 : vector<4x256xf32>
    %88 = vector.broadcast %3 : vector<4x1xf32> to vector<4x256xf32>
    %89 = arith.addf %87, %88 : vector<4x256xf32>
    %c0_41 = arith.constant 0 : index
    %c0_42 = arith.constant 0 : index
    %90 = vector.load %arg9[%c0_41, %c0_42] : memref<4x256xf32, #tpu.memory_space<vmem>>, vector<4x256xf32>
    tpu.vector_store %arg9[%c0_41, %c0_42], %89 {strides = array<i32>} : memref<4x256xf32, #tpu.memory_space<vmem>>, vector<4x256xf32>,
    %c0_43 = arith.constant 0 : index
    %c0_44 = arith.constant 0 : index
    %91 = vector.load %arg9[%c0_43, %c0_44] : memref<4x256xf32, #tpu.memory_space<vmem>>, vector<4x256xf32>
    %92 = arith.truncf %91 : vector<4x256xf32> to vector<4x256xbf16>
    %cst_45 = arith.constant dense<0.000000e+00> : vector<16x256xf32>
    %93 = tpu.matmul %11, %92, %cst_45 {dimension_numbers = #tpu.dot_dimension_numbers<[1], [0], [0], [1], [0, 0, 1, 1], [], []>} : vector<16x4xbf16>, vector<4x256xbf16>, vector<16x256xf32> -> vector<16x256xf32>
    %94 = vector.broadcast %13 : vector<16x1xf32> to vector<16x256xf32>
    %95 = arith.addf %93, %94 : vector<16x256xf32>
    %cst_46 = arith.constant 0.000000e+00 : f32
    %96 = vector.broadcast %cst_46 : f32 to vector<16x256xf32>
    %97 = arith.cmpf oge, %95, %96 : vector<16x256xf32>
    %cst_47 = arith.constant 1.000000e+00 : f32
    %cst_48 = arith.constant -1.000000e+00 : f32
    %98 = vector.broadcast %cst_47 : f32 to vector<16x256xf32>
    %99 = vector.broadcast %cst_48 : f32 to vector<16x256xf32>
    %100 = arith.select %97, %98, %99 : vector<16x256xi1>, vector<16x256xf32>
    %101 = math.absf %95 : vector<16x256xf32>
    %cst_49 = arith.constant 0.707106769 : f32
    %102 = vector.broadcast %cst_49 : f32 to vector<16x256xf32>
    %103 = arith.mulf %101, %102 : vector<16x256xf32>
    %cst_50 = arith.constant 0.327591091 : f32
    %104 = vector.broadcast %cst_50 : f32 to vector<16x256xf32>
    %105 = arith.mulf %104, %103 : vector<16x256xf32>
    %cst_51 = arith.constant 1.000000e+00 : f32
    %106 = vector.broadcast %cst_51 : f32 to vector<16x256xf32>
    %107 = arith.addf %106, %105 : vector<16x256xf32>
    %108 = tpu.reciprocal %107 {approx = true} : vector<16x256xf32> -> vector<16x256xf32>
    %cst_52 = arith.constant 1.06140542 : f32
    %109 = vector.broadcast %cst_52 : f32 to vector<16x256xf32>
    %110 = arith.mulf %109, %108 : vector<16x256xf32>
    %cst_53 = arith.constant 1.45315206 : f32
    %111 = vector.broadcast %cst_53 : f32 to vector<16x256xf32>
    %112 = arith.subf %110, %111 : vector<16x256xf32>
    %113 = arith.mulf %112, %108 : vector<16x256xf32>
    %cst_54 = arith.constant 1.42141378 : f32
    %114 = vector.broadcast %cst_54 : f32 to vector<16x256xf32>
    %115 = arith.addf %113, %114 : vector<16x256xf32>
    %116 = arith.mulf %115, %108 : vector<16x256xf32>
    %cst_55 = arith.constant 0.284496725 : f32
    %117 = vector.broadcast %cst_55 : f32 to vector<16x256xf32>
    %118 = arith.subf %116, %117 : vector<16x256xf32>
    %119 = arith.mulf %118, %108 : vector<16x256xf32>
    %cst_56 = arith.constant 0.254829586 : f32
    %120 = vector.broadcast %cst_56 : f32 to vector<16x256xf32>
    %121 = arith.addf %119, %120 : vector<16x256xf32>
    %122 = arith.mulf %121, %108 : vector<16x256xf32>
    %cst_57 = arith.constant 0.000000e+00 : f32
    %123 = vector.broadcast %cst_57 : f32 to vector<16x256xf32>
    %124 = arith.subf %123, %103 : vector<16x256xf32>
    %125 = arith.mulf %124, %103 : vector<16x256xf32>
    %126 = math.exp %125 : vector<16x256xf32>
    %127 = arith.mulf %122, %126 : vector<16x256xf32>
    %cst_58 = arith.constant 1.000000e+00 : f32
    %128 = vector.broadcast %cst_58 : f32 to vector<16x256xf32>
    %129 = arith.subf %128, %127 : vector<16x256xf32>
    %130 = arith.mulf %100, %129 : vector<16x256xf32>
    %cst_59 = arith.constant 5.000000e-01 : f32
    %131 = vector.broadcast %cst_59 : f32 to vector<16x256xf32>
    %132 = arith.mulf %131, %95 : vector<16x256xf32>
    %cst_60 = arith.constant 1.000000e+00 : f32
    %133 = vector.broadcast %cst_60 : f32 to vector<16x256xf32>
    %134 = arith.addf %133, %130 : vector<16x256xf32>
    %135 = arith.mulf %132, %134 : vector<16x256xf32>
    %136 = arith.truncf %135 : vector<16x256xf32> to vector<16x256xbf16>
    %cst_61 = arith.constant dense<0.000000e+00> : vector<4x256xf32>
    %137 = tpu.matmul %12, %136, %cst_61 {dimension_numbers = #tpu.dot_dimension_numbers<[1], [0], [0], [1], [0, 0, 1, 1], [], []>} : vector<4x16xbf16>, vector<16x256xbf16>, vector<4x256xf32> -> vector<4x256xf32>
    %138 = vector.broadcast %14 : vector<4x1xf32> to vector<4x256xf32>
    %139 = arith.addf %137, %138 : vector<4x256xf32>
    %c0_62 = arith.constant 0 : index
    %c0_63 = arith.constant 0 : index
    %c0_64 = arith.constant 0 : index
    %140 = vector.load %arg8[%c0_62, %c0_63, %c0_64] : memref<1x4x256xf32, #tpu.memory_space<vmem>>, vector<1x4x256xf32>
    %141 = vector.shape_cast %140 : vector<1x4x256xf32> to vector<4x256xf32>
    %142 = vector.broadcast %5 : vector<4x1xf32> to vector<4x256xf32>
    %143 = arith.mulf %142, %139 : vector<4x256xf32>
    %144 = arith.addf %141, %143 : vector<4x256xf32>
    %c0_65 = arith.constant 0 : index
    %c0_66 = arith.constant 0 : index
    %c0_67 = arith.constant 0 : index
    %145 = vector.load %arg8[%c0_65, %c0_66, %c0_67] : memref<1x4x256xf32, #tpu.memory_space<vmem>>, vector<1x4x256xf32>
    %146 = vector.shape_cast %145 : vector<1x4x256xf32> to vector<4x256xf32>
    %147 = vector.shape_cast %144 : vector<4x256xf32> to vector<1x4x256xf32>
    tpu.vector_store %arg8[%c0_65, %c0_66, %c0_67], %147 {strides = array<i32>} : memref<1x4x256xf32, #tpu.memory_space<vmem>>, vector<1x4x256xf32>,
    return
  }
  func.func @transform_0(%arg0: i32) -> (i32, i32, i32) {
    %c0_i32 = arith.constant 0 : i32
    %c0_i32_0 = arith.constant 0 : i32
    %c0_i32_1 = arith.constant 0 : i32
    return %arg0, %c0_i32, %c0_i32_0 : i32, i32, i32
  }
  func.func @transform_1(%arg0: i32) -> (i32, i32) {
    %c0_i32 = arith.constant 0 : i32
    %c0_i32_0 = arith.constant 0 : i32
    %c0_i32_1 = arith.constant 0 : i32
    return %c0_i32, %c0_i32_0 : i32, i32
  }
  func.func @transform_2(%arg0: i32) -> (i32, i32) {
    %c0_i32 = arith.constant 0 : i32
    %c0_i32_0 = arith.constant 0 : i32
    %c0_i32_1 = arith.constant 0 : i32
    return %c0_i32, %c0_i32_0 : i32, i32
  }
  func.func @transform_3(%arg0: i32) -> (i32, i32) {
    %c0_i32 = arith.constant 0 : i32
    %c0_i32_0 = arith.constant 0 : i32
    %c0_i32_1 = arith.constant 0 : i32
    return %c0_i32, %c0_i32_0 : i32, i32
  }
  func.func @transform_4(%arg0: i32) -> (i32, i32) {
    %c0_i32 = arith.constant 0 : i32
    %c0_i32_0 = arith.constant 0 : i32
    %c0_i32_1 = arith.constant 0 : i32
    return %c0_i32, %c0_i32_0 : i32, i32
  }
  func.func @transform_5(%arg0: i32) -> (i32, i32) {
    %c0_i32 = arith.constant 0 : i32
    %c0_i32_0 = arith.constant 0 : i32
    %c0_i32_1 = arith.constant 0 : i32
    return %c0_i32, %c0_i32_0 : i32, i32
  }
  func.func @transform_6(%arg0: i32) -> (i32, i32) {
    %c0_i32 = arith.constant 0 : i32
    %c0_i32_0 = arith.constant 0 : i32
    %c0_i32_1 = arith.constant 0 : i32
    return %c0_i32, %c0_i32_0 : i32, i32
  }
  func.func @transform_7(%arg0: i32) -> (i32, i32, i32) {
    %c0_i32 = arith.constant 0 : i32
    %c0_i32_0 = arith.constant 0 : i32
    %c0_i32_1 = arith.constant 0 : i32
    return %arg0, %c0_i32, %c0_i32_0 : i32, i32, i32
  }
}

module attributes {stable_mosaic.version = 11 : i64} {
  func.func @_poolformer_kernel(%arg0: i32, %arg1: memref<1x4x256xf32, #tpu.memory_space<vmem>>, %arg2: memref<4x6xf32, #tpu.memory_space<vmem>>, %arg3: memref<6x256xf32, #tpu.memory_space<vmem>>, %arg4: memref<16x4xbf16, #tpu.memory_space<vmem>>, %arg5: memref<16x1xf32, #tpu.memory_space<vmem>>, %arg6: memref<4x16xbf16, #tpu.memory_space<vmem>>, %arg7: memref<4x1xf32, #tpu.memory_space<vmem>>, %arg8: memref<1x4x256xf32, #tpu.memory_space<vmem>>, %arg9: memref<4x256xf32, #tpu.memory_space<vmem>>) attributes {dimension_semantics = [#tpu.dimension_semantics<parallel>], iteration_bounds = array<i64: 2>, scalar_prefetch = 0 : i64, scratch_operands = 1 : i64, tpu.core_type = #tpu.core_type<tc>, window_params = [{transform_indices = @transform_0, window_bounds = array<i64: 1, 4, 256>}, {pipeline_mode = #tpu.pipeline_mode<synchronous>, transform_indices = @transform_1, window_bounds = array<i64: 4, 6>}, {pipeline_mode = #tpu.pipeline_mode<synchronous>, transform_indices = @transform_2, window_bounds = array<i64: 6, 256>}, {pipeline_mode = #tpu.pipeline_mode<synchronous>, transform_indices = @transform_3, window_bounds = array<i64: 16, 4>}, {pipeline_mode = #tpu.pipeline_mode<synchronous>, transform_indices = @transform_4, window_bounds = array<i64: 16, 1>}, {pipeline_mode = #tpu.pipeline_mode<synchronous>, transform_indices = @transform_5, window_bounds = array<i64: 4, 16>}, {pipeline_mode = #tpu.pipeline_mode<synchronous>, transform_indices = @transform_6, window_bounds = array<i64: 4, 1>}, {transform_indices = @transform_7, window_bounds = array<i64: 1, 4, 256>}]} {
    %c0 = arith.constant 0 : index
    %c0_0 = arith.constant 0 : index
    %0 = vector.load %arg2[%c0, %c0_0] : memref<4x6xf32, #tpu.memory_space<vmem>>, vector<4x1xf32>
    %c0_1 = arith.constant 0 : index
    %c1 = arith.constant 1 : index
    %1 = vector.load %arg2[%c0_1, %c1] : memref<4x6xf32, #tpu.memory_space<vmem>>, vector<4x1xf32>
    %c0_2 = arith.constant 0 : index
    %c2 = arith.constant 2 : index
    %2 = vector.load %arg2[%c0_2, %c2] : memref<4x6xf32, #tpu.memory_space<vmem>>, vector<4x1xf32>
    %c0_3 = arith.constant 0 : index
    %c3 = arith.constant 3 : index
    %3 = vector.load %arg2[%c0_3, %c3] : memref<4x6xf32, #tpu.memory_space<vmem>>, vector<4x1xf32>
    %c0_4 = arith.constant 0 : index
    %c4 = arith.constant 4 : index
    %4 = vector.load %arg2[%c0_4, %c4] : memref<4x6xf32, #tpu.memory_space<vmem>>, vector<4x1xf32>
    %c0_5 = arith.constant 0 : index
    %c5 = arith.constant 5 : index
    %5 = vector.load %arg2[%c0_5, %c5] : memref<4x6xf32, #tpu.memory_space<vmem>>, vector<4x1xf32>
    %c0_6 = arith.constant 0 : index
    %c0_7 = arith.constant 0 : index
    %6 = vector.load %arg3[%c0_6, %c0_7] : memref<6x256xf32, #tpu.memory_space<vmem>>, vector<1x256xf32>
    %c1_8 = arith.constant 1 : index
    %c0_9 = arith.constant 0 : index
    %7 = vector.load %arg3[%c1_8, %c0_9] : memref<6x256xf32, #tpu.memory_space<vmem>>, vector<1x256xf32>
    %c2_10 = arith.constant 2 : index
    %c0_11 = arith.constant 0 : index
    %8 = vector.load %arg3[%c2_10, %c0_11] : memref<6x256xf32, #tpu.memory_space<vmem>>, vector<1x256xf32>
    %c3_12 = arith.constant 3 : index
    %c0_13 = arith.constant 0 : index
    %9 = vector.load %arg3[%c3_12, %c0_13] : memref<6x256xf32, #tpu.memory_space<vmem>>, vector<1x256xf32>
    %c4_14 = arith.constant 4 : index
    %c0_15 = arith.constant 0 : index
    %10 = vector.load %arg3[%c4_14, %c0_15] : memref<6x256xf32, #tpu.memory_space<vmem>>, vector<1x256xf32>
    %c0_16 = arith.constant 0 : index
    %c0_17 = arith.constant 0 : index
    %11 = vector.load %arg4[%c0_16, %c0_17] : memref<16x4xbf16, #tpu.memory_space<vmem>>, vector<16x4xbf16>
    %c0_18 = arith.constant 0 : index
    %c0_19 = arith.constant 0 : index
    %12 = vector.load %arg6[%c0_18, %c0_19] : memref<4x16xbf16, #tpu.memory_space<vmem>>, vector<4x16xbf16>
    %c0_20 = arith.constant 0 : index
    %c0_21 = arith.constant 0 : index
    %13 = vector.load %arg5[%c0_20, %c0_21] : memref<16x1xf32, #tpu.memory_space<vmem>>, vector<16x1xf32>
    %c0_22 = arith.constant 0 : index
    %c0_23 = arith.constant 0 : index
    %14 = vector.load %arg7[%c0_22, %c0_23] : memref<4x1xf32, #tpu.memory_space<vmem>>, vector<4x1xf32>
    %c0_24 = arith.constant 0 : index
    %c0_25 = arith.constant 0 : index
    %c0_26 = arith.constant 0 : index
    %15 = vector.load %arg1[%c0_24, %c0_25, %c0_26] : memref<1x4x256xf32, #tpu.memory_space<vmem>>, vector<1x4x256xf32>
    %16 = vector.shape_cast %15 : vector<1x4x256xf32> to vector<4x256xf32>
    %17 = vector.shape_cast %16 : vector<4x256xf32> to vector<1x4x256xf32>
    %cst = arith.constant dense<0.000000e+00> : vector<1xf32>
    %18 = vector.multi_reduction <add>, %17, %cst [1, 2] : vector<1x4x256xf32> to vector<1xf32>
    %19 = vector.shape_cast %18 : vector<1xf32> to vector<1x1x1xf32>
    %20 = vector.extract %19[0, 0, 0] : f32 from vector<1x1x1xf32>
    %cst_27 = arith.constant 9.765625E-4 : f32
    %21 = arith.mulf %20, %cst_27 : f32
    %22 = vector.broadcast %21 : f32 to vector<4x256xf32>
    %23 = arith.subf %16, %22 : vector<4x256xf32>
    %24 = arith.mulf %23, %23 : vector<4x256xf32>
    %25 = vector.shape_cast %24 : vector<4x256xf32> to vector<1x4x256xf32>
    %cst_28 = arith.constant dense<0.000000e+00> : vector<1xf32>
    %26 = vector.multi_reduction <add>, %25, %cst_28 [1, 2] : vector<1x4x256xf32> to vector<1xf32>
    %27 = vector.shape_cast %26 : vector<1xf32> to vector<1x1x1xf32>
    %28 = vector.extract %27[0, 0, 0] : f32 from vector<1x1x1xf32>
    %29 = arith.mulf %21, %21 : f32
    %cst_29 = arith.constant 0.000000e+00 : f32
    %30 = arith.mulf %cst_29, %29 : f32
    %31 = arith.subf %28, %30 : f32
    %cst_30 = arith.constant 9.765625E-4 : f32
    %32 = arith.mulf %31, %cst_30 : f32
    %cst_31 = arith.constant 9.99999974E-6 : f32
    %33 = arith.addf %32, %cst_31 : f32
    %34 = math.rsqrt %33 : f32
    %35 = vector.broadcast %34 : f32 to vector<4x1xf32>
    %36 = arith.mulf %0, %35 : vector<4x1xf32>
    %37 = vector.broadcast %36 : vector<4x1xf32> to vector<4x256xf32>
    %38 = arith.mulf %23, %37 : vector<4x256xf32>
    %39 = vector.broadcast %1 : vector<4x1xf32> to vector<4x256xf32>
    %40 = arith.addf %38, %39 : vector<4x256xf32>
    %c255_i32 = arith.constant 255 : i32
    %41 = tpu.dynamic_rotate %40 by %c255_i32 dim 1 : vector<4x256xf32>, i32 -> vector<4x256xf32>
    %42 = vector.broadcast %6 : vector<1x256xf32> to vector<4x256xf32>
    %43 = arith.mulf %41, %42 : vector<4x256xf32>
    %c1_i32 = arith.constant 1 : i32
    %44 = tpu.dynamic_rotate %40 by %c1_i32 dim 1 : vector<4x256xf32>, i32 -> vector<4x256xf32>
    %45 = vector.broadcast %7 : vector<1x256xf32> to vector<4x256xf32>
    %46 = arith.mulf %44, %45 : vector<4x256xf32>
    %47 = arith.addf %40, %43 : vector<4x256xf32>
    %48 = arith.addf %47, %46 : vector<4x256xf32>
    %c240_i32 = arith.constant 240 : i32
    %49 = tpu.dynamic_rotate %48 by %c240_i32 dim 1 : vector<4x256xf32>, i32 -> vector<4x256xf32>
    %50 = vector.broadcast %8 : vector<1x256xf32> to vector<4x256xf32>
    %51 = arith.mulf %49, %50 : vector<4x256xf32>
    %c16_i32 = arith.constant 16 : i32
    %52 = tpu.dynamic_rotate %48 by %c16_i32 dim 1 : vector<4x256xf32>, i32 -> vector<4x256xf32>
    %53 = vector.broadcast %9 : vector<1x256xf32> to vector<4x256xf32>
    %54 = arith.mulf %52, %53 : vector<4x256xf32>
    %55 = arith.addf %48, %51 : vector<4x256xf32>
    %56 = arith.addf %55, %54 : vector<4x256xf32>
    %57 = vector.broadcast %10 : vector<1x256xf32> to vector<4x256xf32>
    %58 = arith.mulf %56, %57 : vector<4x256xf32>
    %59 = arith.subf %58, %40 : vector<4x256xf32>
    %60 = vector.broadcast %4 : vector<4x1xf32> to vector<4x256xf32>
    %61 = arith.mulf %60, %59 : vector<4x256xf32>
    %62 = arith.addf %16, %61 : vector<4x256xf32>
    %c0_32 = arith.constant 0 : index
    %c0_33 = arith.constant 0 : index
    %c0_34 = arith.constant 0 : index
    %63 = vector.load %arg8[%c0_32, %c0_33, %c0_34] : memref<1x4x256xf32, #tpu.memory_space<vmem>>, vector<1x4x256xf32>
    %64 = vector.shape_cast %63 : vector<1x4x256xf32> to vector<4x256xf32>
    %65 = vector.shape_cast %62 : vector<4x256xf32> to vector<1x4x256xf32>
    tpu.vector_store %arg8[%c0_32, %c0_33, %c0_34], %65 {strides = array<i32>} : memref<1x4x256xf32, #tpu.memory_space<vmem>>, vector<1x4x256xf32>,
    %66 = vector.shape_cast %62 : vector<4x256xf32> to vector<1x4x256xf32>
    %cst_35 = arith.constant dense<0.000000e+00> : vector<1xf32>
    %67 = vector.multi_reduction <add>, %66, %cst_35 [1, 2] : vector<1x4x256xf32> to vector<1xf32>
    %68 = vector.shape_cast %67 : vector<1xf32> to vector<1x1x1xf32>
    %69 = vector.extract %68[0, 0, 0] : f32 from vector<1x1x1xf32>
    %cst_36 = arith.constant 9.765625E-4 : f32
    %70 = arith.mulf %69, %cst_36 : f32
    %71 = vector.broadcast %70 : f32 to vector<4x256xf32>
    %72 = arith.subf %62, %71 : vector<4x256xf32>
    %73 = arith.mulf %72, %72 : vector<4x256xf32>
    %74 = vector.shape_cast %73 : vector<4x256xf32> to vector<1x4x256xf32>
    %cst_37 = arith.constant dense<0.000000e+00> : vector<1xf32>
    %75 = vector.multi_reduction <add>, %74, %cst_37 [1, 2] : vector<1x4x256xf32> to vector<1xf32>
    %76 = vector.shape_cast %75 : vector<1xf32> to vector<1x1x1xf32>
    %77 = vector.extract %76[0, 0, 0] : f32 from vector<1x1x1xf32>
    %78 = arith.mulf %70, %70 : f32
    %cst_38 = arith.constant 0.000000e+00 : f32
    %79 = arith.mulf %cst_38, %78 : f32
    %80 = arith.subf %77, %79 : f32
    %cst_39 = arith.constant 9.765625E-4 : f32
    %81 = arith.mulf %80, %cst_39 : f32
    %cst_40 = arith.constant 9.99999974E-6 : f32
    %82 = arith.addf %81, %cst_40 : f32
    %83 = math.rsqrt %82 : f32
    %84 = vector.broadcast %83 : f32 to vector<4x1xf32>
    %85 = arith.mulf %2, %84 : vector<4x1xf32>
    %86 = vector.broadcast %85 : vector<4x1xf32> to vector<4x256xf32>
    %87 = arith.mulf %72, %86 : vector<4x256xf32>
    %88 = vector.broadcast %3 : vector<4x1xf32> to vector<4x256xf32>
    %89 = arith.addf %87, %88 : vector<4x256xf32>
    %c0_41 = arith.constant 0 : index
    %c0_42 = arith.constant 0 : index
    %90 = vector.load %arg9[%c0_41, %c0_42] : memref<4x256xf32, #tpu.memory_space<vmem>>, vector<4x256xf32>
    tpu.vector_store %arg9[%c0_41, %c0_42], %89 {strides = array<i32>} : memref<4x256xf32, #tpu.memory_space<vmem>>, vector<4x256xf32>,
    %c0_43 = arith.constant 0 : index
    %c0_44 = arith.constant 0 : index
    %91 = vector.load %arg9[%c0_43, %c0_44] : memref<4x256xf32, #tpu.memory_space<vmem>>, vector<4x256xf32>
    %92 = arith.truncf %91 : vector<4x256xf32> to vector<4x256xbf16>
    %cst_45 = arith.constant dense<0.000000e+00> : vector<16x256xf32>
    %93 = tpu.matmul %11, %92, %cst_45 {dimension_numbers = #tpu.dot_dimension_numbers<[1], [0], [0], [1], [0, 0, 1, 1], [], []>} : vector<16x4xbf16>, vector<4x256xbf16>, vector<16x256xf32> -> vector<16x256xf32>
    %94 = vector.broadcast %13 : vector<16x1xf32> to vector<16x256xf32>
    %95 = arith.addf %93, %94 : vector<16x256xf32>
    %cst_46 = arith.constant 0.000000e+00 : f32
    %96 = vector.broadcast %cst_46 : f32 to vector<16x256xf32>
    %97 = arith.cmpf oge, %95, %96 : vector<16x256xf32>
    %cst_47 = arith.constant 1.000000e+00 : f32
    %cst_48 = arith.constant -1.000000e+00 : f32
    %98 = vector.broadcast %cst_47 : f32 to vector<16x256xf32>
    %99 = vector.broadcast %cst_48 : f32 to vector<16x256xf32>
    %100 = arith.select %97, %98, %99 : vector<16x256xi1>, vector<16x256xf32>
    %101 = math.absf %95 : vector<16x256xf32>
    %cst_49 = arith.constant 0.707106769 : f32
    %102 = vector.broadcast %cst_49 : f32 to vector<16x256xf32>
    %103 = arith.mulf %101, %102 : vector<16x256xf32>
    %cst_50 = arith.constant 0.327591091 : f32
    %104 = vector.broadcast %cst_50 : f32 to vector<16x256xf32>
    %105 = arith.mulf %104, %103 : vector<16x256xf32>
    %cst_51 = arith.constant 1.000000e+00 : f32
    %106 = vector.broadcast %cst_51 : f32 to vector<16x256xf32>
    %107 = arith.addf %106, %105 : vector<16x256xf32>
    %108 = tpu.reciprocal %107 {approx = true} : vector<16x256xf32> -> vector<16x256xf32>
    %cst_52 = arith.constant 1.06140542 : f32
    %109 = vector.broadcast %cst_52 : f32 to vector<16x256xf32>
    %110 = arith.mulf %109, %108 : vector<16x256xf32>
    %cst_53 = arith.constant 1.45315206 : f32
    %111 = vector.broadcast %cst_53 : f32 to vector<16x256xf32>
    %112 = arith.subf %110, %111 : vector<16x256xf32>
    %113 = arith.mulf %112, %108 : vector<16x256xf32>
    %cst_54 = arith.constant 1.42141378 : f32
    %114 = vector.broadcast %cst_54 : f32 to vector<16x256xf32>
    %115 = arith.addf %113, %114 : vector<16x256xf32>
    %116 = arith.mulf %115, %108 : vector<16x256xf32>
    %cst_55 = arith.constant 0.284496725 : f32
    %117 = vector.broadcast %cst_55 : f32 to vector<16x256xf32>
    %118 = arith.subf %116, %117 : vector<16x256xf32>
    %119 = arith.mulf %118, %108 : vector<16x256xf32>
    %cst_56 = arith.constant 0.254829586 : f32
    %120 = vector.broadcast %cst_56 : f32 to vector<16x256xf32>
    %121 = arith.addf %119, %120 : vector<16x256xf32>
    %122 = arith.mulf %121, %108 : vector<16x256xf32>
    %cst_57 = arith.constant 0.000000e+00 : f32
    %123 = vector.broadcast %cst_57 : f32 to vector<16x256xf32>
    %124 = arith.subf %123, %103 : vector<16x256xf32>
    %125 = arith.mulf %124, %103 : vector<16x256xf32>
    %126 = math.exp %125 : vector<16x256xf32>
    %127 = arith.mulf %122, %126 : vector<16x256xf32>
    %cst_58 = arith.constant 1.000000e+00 : f32
    %128 = vector.broadcast %cst_58 : f32 to vector<16x256xf32>
    %129 = arith.subf %128, %127 : vector<16x256xf32>
    %130 = arith.mulf %100, %129 : vector<16x256xf32>
    %cst_59 = arith.constant 5.000000e-01 : f32
    %131 = vector.broadcast %cst_59 : f32 to vector<16x256xf32>
    %132 = arith.mulf %131, %95 : vector<16x256xf32>
    %cst_60 = arith.constant 1.000000e+00 : f32
    %133 = vector.broadcast %cst_60 : f32 to vector<16x256xf32>
    %134 = arith.addf %133, %130 : vector<16x256xf32>
    %135 = arith.mulf %132, %134 : vector<16x256xf32>
    %136 = arith.truncf %135 : vector<16x256xf32> to vector<16x256xbf16>
    %cst_61 = arith.constant dense<0.000000e+00> : vector<4x256xf32>
    %137 = tpu.matmul %12, %136, %cst_61 {dimension_numbers = #tpu.dot_dimension_numbers<[1], [0], [0], [1], [0, 0, 1, 1], [], []>} : vector<4x16xbf16>, vector<16x256xbf16>, vector<4x256xf32> -> vector<4x256xf32>
    %138 = vector.broadcast %14 : vector<4x1xf32> to vector<4x256xf32>
    %139 = arith.addf %137, %138 : vector<4x256xf32>
    %c0_62 = arith.constant 0 : index
    %c0_63 = arith.constant 0 : index
    %c0_64 = arith.constant 0 : index
    %140 = vector.load %arg8[%c0_62, %c0_63, %c0_64] : memref<1x4x256xf32, #tpu.memory_space<vmem>>, vector<1x4x256xf32>
    %141 = vector.shape_cast %140 : vector<1x4x256xf32> to vector<4x256xf32>
    %142 = vector.broadcast %5 : vector<4x1xf32> to vector<4x256xf32>
    %143 = arith.mulf %142, %139 : vector<4x256xf32>
    %144 = arith.addf %141, %143 : vector<4x256xf32>
    %c0_65 = arith.constant 0 : index
    %c0_66 = arith.constant 0 : index
    %c0_67 = arith.constant 0 : index
    %145 = vector.load %arg8[%c0_65, %c0_66, %c0_67] : memref<1x4x256xf32, #tpu.memory_space<vmem>>, vector<1x4x256xf32>
    %146 = vector.shape_cast %145 : vector<1x4x256xf32> to vector<4x256xf32>
    %147 = vector.shape_cast %144 : vector<4x256xf32> to vector<1x4x256xf32>
    tpu.vector_store %arg8[%c0_65, %c0_66, %c0_67], %147 {strides = array<i32>} : memref<1x4x256xf32, #tpu.memory_space<vmem>>, vector<1x4x256xf32>,
    return
  }
  func.func @transform_0(%arg0: i32) -> (i32, i32, i32) {
    %c0_i32 = arith.constant 0 : i32
    %c0_i32_0 = arith.constant 0 : i32
    %c0_i32_1 = arith.constant 0 : i32
    return %arg0, %c0_i32, %c0_i32_0 : i32, i32, i32
  }
  func.func @transform_1(%arg0: i32) -> (i32, i32) {
    %c0_i32 = arith.constant 0 : i32
    %c0_i32_0 = arith.constant 0 : i32
    %c0_i32_1 = arith.constant 0 : i32
    return %c0_i32, %c0_i32_0 : i32, i32
  }
  func.func @transform_2(%arg0: i32) -> (i32, i32) {
    %c0_i32 = arith.constant 0 : i32
    %c0_i32_0 = arith.constant 0 : i32
    %c0_i32_1 = arith.constant 0 : i32
    return %c0_i32, %c0_i32_0 : i32, i32
  }
  func.func @transform_3(%arg0: i32) -> (i32, i32) {
    %c0_i32 = arith.constant 0 : i32
    %c0_i32_0 = arith.constant 0 : i32
    %c0_i32_1 = arith.constant 0 : i32
    return %c0_i32, %c0_i32_0 : i32, i32
  }
  func.func @transform_4(%arg0: i32) -> (i32, i32) {
    %c0_i32 = arith.constant 0 : i32
    %c0_i32_0 = arith.constant 0 : i32
    %c0_i32_1 = arith.constant 0 : i32
    return %c0_i32, %c0_i32_0 : i32, i32
  }
  func.func @transform_5(%arg0: i32) -> (i32, i32) {
    %c0_i32 = arith.constant 0 : i32
    %c0_i32_0 = arith.constant 0 : i32
    %c0_i32_1 = arith.constant 0 : i32
    return %c0_i32, %c0_i32_0 : i32, i32
  }
  func.func @transform_6(%arg0: i32) -> (i32, i32) {
    %c0_i32 = arith.constant 0 : i32
    %c0_i32_0 = arith.constant 0 : i32
    %c0_i32_1 = arith.constant 0 : i32
    return %c0_i32, %c0_i32_0 : i32, i32
  }
  func.func @transform_7(%arg0: i32) -> (i32, i32, i32) {
    %c0_i32 = arith.constant 0 : i32
    %c0_i32_0 = arith.constant 0 : i32
    %c0_i32_1 = arith.constant 0 : i32
    return %arg0, %c0_i32, %c0_i32_0 : i32, i32, i32
  }
}

</mosaic_0001>

<bundles_post_ra>
// kernel: tpu_custom_call.1
= control target key start
LH: loop header
LB: loop body
LE: loop exit
PB: predicated region body
PF: predicated region fallthrough
CT: control target
= control target key end

     0   :  { %12 = vsyncpa [#allocation4], 0  ;;  %s1400_s0 = inlined_call_operand.vmem [shape: f32[2,4,256], index: 0, kind: input, shape index: {}]   ;;  %s1401_s1 = inlined_call_operand.hbm [shape: f32[4,6], index: 1, kind: input, shape index: {}]   ;;  %s1402_s2 = inlined_call_operand.vmem [shape: f32[6,256], index: 2, kind: input, shape index: {}]   ;;  %s1403_s3 = inlined_call_operand.vmem [shape: bf16[16,4], index: 3, kind: input, shape index: {}]   ;;  %s1404_s4 = inlined_call_operand.vmem [shape: f32[16,1], index: 4, kind: input, shape index: {}]   ;;  %s1405_s5 = inlined_call_operand.vmem [shape: bf16[4,16], index: 5, kind: input, shape index: {}]   ;;  %s1406_s6 = inlined_call_operand.vmem [shape: f32[4,1], index: 6, kind: input, shape index: {}]   ;;  %s1407_s7 = inlined_call_operand.hbm [shape: f32[2,4,256], index: 7, kind: output, shape index: {}]  }
   0x1   :  { %13 = vsyncpa [#allocation5], 0 }
   0x2   :  { %15 = vsyncpa [#allocation5 + $0x1], 0  ;;  %s1197_s24 = smov 0   ;;  %s1199_s25 = smov 0  }
   0x3   :  { %s1201_s26 = smov 0   ;;  %s1203_s27 = smov 0  }
   0x4 LB: > { %s1218_s28 = sadd.s32 4294967295, %s1141_s27   ;;  %s915_s29 = sadd.s32 4294967294, %s1141_s27   ;;  %s1141_s27 = sphi %s1203_s27, %s1415_s27   ;;  %s1137_s26 = sphi %s1201_s26, %s1414_s26   ;;  %s1133_s25 = sphi %s1199_s25, %s1413_s25   ;;  %s1129_s24 = sphi %s1197_s24, %s1412_s24  }
   0x5   : > { %s1222_s30 = sadd.s32 1, %s1141_s27   ;;  %s180_s8 = sadd.s32 1, %s1137_s26 }
   0x6   : > { %s177_s9 = ssub.s32 %s1141_s27, %s1222_s30  ;;  %p190_p0 = scmp.ne.s32.totalorder %s1137_s26, %s1133_s25 }
   0x7   : > { %p178_p1 = scmp.eq.s32.totalorder %s177_s9, 0  ;;  %p191_p2 = scmp.eq.s32.totalorder %s1218_s28, 1 }
   0x8   : > { %p196_p3 = scmp.ne.s32.totalorder %s1133_s25, %s1129_s24  ;;  %p197_p4 = scmp.eq.s32.totalorder %s915_s29, 1 }
   0x9   : > { %s1233_s10 = scalar_select %p178_p1, %s1137_s26, %s180_s8  }
   0xa   : > { %p1235_p5 = por %p191_p2, %p190_p0  ;;  %p1239_p6 = por %p197_p4, %p196_p3 }
   0xb   : > { %p916_p7 = scmp.ge.s32.totalorder %s1141_s27, 1  ;;  %p204_p8 = scmp.lt.s32.totalorder %s1141_s27, 3 }
   0xc   : > { %s1409_s12 = scalar_select %p1239_p6, 1, 0 }
   0xd   : > { %p973_p9 = scmp.eq.s32.totalorder %s1218_s28, 0  ;;  %p1246_p10 = pnand %p916_p7, %p204_p8 }
   0xe   : > { %s1143_s14 = smov [#allocation3]  }
   0xf   : > { %s217_s15 = sshll.u32 %s1143_s14, 4  ;;  %p965_p11 = pneg %p1246_p10  ;;  %s218_s15 = int_to_ptr.vmem [resolvable:$true] %s217_s15 }
  0x10   : > { %s1062_s16 = scalar_lea.vmem %s218_s15, 64  ;;  %p1070_p3 = scmp.lt.s32.totalorder %s218_s15, %s218_s15 }
  0x11   : > { %p966_p12 = pnand %p973_p9, %p965_p11  ;;  %p1063_p0 = scmp.ne.s32.totalorder %s218_s15, %s1062_s16 }
  0x12   : > { %p1071_p4 = scmp.lt.s32.totalorder %s1062_s16, %s1062_s16 }
  0x13   : > { %p1053_p13 = pneg %p966_p12 }
  0x14   : > { %p1072_p6 = por %p1071_p4, %p1070_p3 }
  0x15   : > { %p1065_p1 = pnand %p1063_p0, %p1053_p13 }
  0x17   : > { %p1066_p2 = pneg %p1065_p1 }
  0x19   : > { %p1073_p7 = pnand %p1072_p6, %p1066_p2 }
  0x1b   : > { %1076 = shalt.err (!%p1073_p7)
}
  0x1c   : > { %968 = dma.hbm_to_vmem [thread:$0]  (!%p966_p12), %s1401_s1, 64, %s218_s15, [#allocation4]  }
  0x1d   : > { %253 = sbr.rel (%p1246_p10) target bundleno = 2041 (0x7f9), region = 48 }
  0x22   : > { %1120 = dma.done.wait (%p973_p9), [#allocation4], 64  }
  0x23   : > { %1122 = vsyncadd (%p973_p9), [#allocation4], 4294967232  ;;  %p285_p8 = scmp.lt.s32.totalorder %s1218_s28, 1  ;;  %vm311_vm0 = vcmask 1043456   ;;  %v1144_v24 = vmov 0   ;;  %v1145_v32 = vmov 1   ;;  %v360_v35 = vlaneseq }
  0x24   : > { %1021 = vset.pattern.permute.xlu1 %v1144_v24  ;;  %649 = vmatprep.mubr.bf16.mxu0 %v1144_v24  ;;  %v1281_v29 = vld [vmem:[#allocation3] sm:$0xf]  ;;  %v1146_v33 = vmov 839922192   ;;  %v1149_v46 = vmov 4   ;;  %vm610_vm5 = vcmask 1041408  }
  0x25   : > { %s286_s19 = scalar_select %p285_p8, %s1218_s28, 1  ;;  %807 = vmatprep.mubr.bf16.mxu1 %v1144_v24  ;;  %v358_v34 = vunpack.c.l.s4 %v1146_v33  ;;  %v361_v37 = vshrl.u32 %v360_v35, 7  ;;  %v387_v47 = vand.u32 127, %v360_v35  ;;  %v292_v50 = vld [vmem:[%s1402_s2] ss:$8 sm:$0x3] }
  0x26   : > { %v924_v54 = vld [vmem:[%s1402_s2 + $0x1] ss:$8 sm:$0x3]  ;;  %vm606_vm6 = vcmask 31744   ;;  %vm771_vm11 = vcmask 130048  }
  0x27   : > { %s945_s20 = sshll.u32 %s286_s19, 3  ;;  %v359_v36 = vunpack.c.0.s8 %v358_v34  ;;  %s1147_s19 = smov 1   ;;  %v394_v48 = vsub.s32 0, %v361_v37  ;;  %v398_v49 = vsub.s32 1, %v361_v37  ;;  %vm388_vm1 = vcmp.lt.s32.totalorder %v387_v47, 127 }
  0x28   : > { %s289_s23 = scalar_lea.vmem %s1400_s0, %s945_s20  ;;  %s1148_s20 = smov 127   ;;  %vm408_vm2 = vcmp.lt.s32.totalorder %v387_v47, 1  ;;  %vm441_vm3 = vcmp.lt.s32.totalorder %v387_v47, 112  ;;  %vm461_vm4 = vcmp.lt.s32.totalorder %v387_v47, 16 }
  0x29   : > { %v1268_v0 = vld [vmem:[%s289_s23] sm:$0xff]  ;;  %v1285_v38 = vsub.s32 %v359_v36, %v361_v37  ;;  %v395_v52 = vrot.slane %v292_v50, %v394_v48  ;;  %v399_v53 = vrot.slane %v292_v50, %v398_v49  ;;  %v415_v61 = vrot.slane %v924_v54, %v394_v48 }
  0x2a   : > { %v309_v1 = vcombine.high %v1268_v0, %v1268_v0  ;;  %v312_v2 = vsel %vm311_vm0, %v1268_v0, 0.0  ;;  %v419_v62 = vrot.slane %v924_v54, %v398_v49 }
  0x2c   : > { %v313_v3 = vsel %vm311_vm0, %v309_v1, 0.0 }
  0x2d   : > { %v314_v4 = vadd.f32 %v313_v3, %v312_v2 }
  0x2f   : > { %315 = vadd.xlane.f32.xlu0 %v314_v4 }
  0xb8   : > { %v316_v5 = vpop.xlane.xlu0 %315 }
  0xb9   : > { %v317_v6 = vrot.slane %v316_v5, 4 }
  0xbb   : > { %v318_v7 = vadd.f32 %v317_v6, %v316_v5 }
  0xbd   : > { %v319_v8 = vrot.slane %v318_v7, 2 }
  0xbf   : > { %v320_v9 = vadd.f32 %v319_v8, %v318_v7 }
  0xc1   : > { %v321_v10 = vrot.slane %v320_v9, 1 }
  0xc3   : > { %v322_v11 = vadd.f32 %v321_v10, %v320_v9  ;;  %v925_v10 = vld [vmem:[%s1402_s2 + $0x2] ss:$8 sm:$0x3] }
  0xc5   : > { %947 = vpush %v322_v11 }
  0xf6   : > { %s948_s29 = spop %947 }
  0xf7   : > { %s324_s8 = smul.f32 0.0009765625, %s948_s29 }
  0xf9   : > { %v325_v12 = vstv %s324_s8  ;;  %s343_s9 = smul.f32 %s324_s8, %s324_s8  ;;  %s1150_s8 = smov 112  }
  0xfa   : > { %v326_v13 = vsub.f32 %v1268_v0, %v325_v12  ;;  %v448_v12 = vrot.slane %v925_v10, %v394_v48 }
  0xfb   : > { %s344_s13 = smul.f32 0.0, %s343_s9  ;;  %s1151_s9 = smov 16  }
  0xfc   : > { %v327_v14 = vmul.f32 %v326_v13, %v326_v13 }
  0xfe   : > { %v329_v15 = vcombine.high %v327_v14, %v327_v14  ;;  %v331_v16 = vsel %vm311_vm0, %v327_v14, 0.0  ;;  %v926_v14 = vld [vmem:[%s1402_s2 + $0x3] ss:$8 sm:$0x3] }
 0x100   : > { %v332_v17 = vsel %vm311_vm0, %v329_v15, 0.0 }
 0x101   : > { %v333_v18 = vadd.f32 %v332_v17, %v331_v16 }
 0x103   : > { %334 = vadd.xlane.f32.xlu0 %v333_v18  ;;  %v927_v18 = vld [vmem:[%s1402_s2 + $0x4] ss:$8 sm:$0x3] }
 0x18c   : > { %v335_v19 = vpop.xlane.xlu0 %334 }
 0x18d   : > { %v336_v20 = vrot.slane %v335_v19, 4 }
 0x18f   : > { %v337_v21 = vadd.f32 %v336_v20, %v335_v19 }
 0x191   : > { %v338_v22 = vrot.slane %v337_v21, 2 }
 0x193   : > { %v339_v23 = vadd.f32 %v338_v22, %v337_v21  ;;  %v468_v21 = vrot.slane %v926_v14, %v394_v48  ;;  %v472_v22 = vrot.slane %v926_v14, %v398_v49  ;;  %v304_v14 = vld [vmem:[%s1404_s4] sm:$0xff] }
 0x195   : > { %v340_v25 = vrot.slane %v339_v23, 1 }
 0x197   : > { %v341_v26 = vadd.f32 %v340_v25, %v339_v23 }
 0x199   : > { %949 = vpush %v341_v26 }
 0x1ca   : > { %s950_s14 = spop %949 }
 0x1cb   : > { %s345_s15 = ssub.f32 %s950_s14, %s344_s13 }
 0x1cd   : > { %s346_s16 = smul.f32 0.0009765625, %s345_s15 }
 0x1cf   : > { %s347_s17 = sadd.f32 1e-05, %s346_s16 }
 0x1d1   : > { %v348_v27 = vstv %s347_s17 }
 0x1d2   : > { %1031 = vrsqrt.f32 %v348_v27  ;;  %v491_v27 = vrot.slane %v927_v18, %v394_v48 }
 0x1df   : > { %v1032_v28 = vpop.eup %1031 }
 0x1e0   : > { %951 = vpush %v1032_v28  ;;  %v495_v28 = vrot.slane %v927_v18, %v398_v49 }
 0x1e2   : > { %v496_v36 = vcombine.low %v491_v27, %v495_v28  ;;  %v1030_v27 = vld [vmem:[%s1403_s3] sm:$0xff]   ;;  %v1154_v28 = vmov 5  }
 0x211   : > { %s952_s18 = spop %951 }
 0x212   : > { %v351_v30 = vstv %s952_s18 }
 0x213   : > { %v352_v31 = vmul.f32 %v351_v30, %v1281_v29 }
 0x215   : > { %355 = vperm.xlu1 %1021, %v352_v31  }
 0x219   : > { %1022 = vset.pattern.permute.xlu1 %v1145_v32 }
 0x21a   : > { %368 = vperm.xlu1 %1022, %v1281_v29  }
 0x21e   : > { %1023 = vset.pattern.permute.xlu1 %v1149_v46 }
 0x290   : > { %v356_v39 = vpop.permute.xlu1 %355 }
 0x291   : > { %v363_v40 = vrot.slane %v356_v39, %v1285_v38 }
 0x293   : > { %v365_v42 = vmul.f32 %v363_v40, %v326_v13  ;;  %v452_v13 = vrot.slane %v925_v10, %v398_v49 }
 0x295   : > { %v369_v41 = vpop.permute.xlu1 %368 }
 0x296   : > { %v376_v43 = vrot.slane %v369_v41, %v1285_v38 }
 0x298   : > { %v1289_v44 = vadd.f32 %v376_v43, %v365_v42 }
 0x29a   : > { %404 = vrot.lane.b32.xlu1 %v1289_v44, %s1147_s19  ;;  %382 = vrot.lane.b32.xlu0 %v1289_v44, %s1148_s20  ;;  %v380_v45 = vcombine.high %v1289_v44, %v1289_v44 }
 0x29e   : > { %384 = vrot.lane.b32.xlu1 %v380_v45, %s1148_s20 }
 0x2a2   : > { %406 = vrot.lane.b32.xlu1 %v380_v45, %s1147_s19 }
 0x30c   : > { %v405_v51 = vpop.permute.xlu1 %404  ;;  %v383_v55 = vpop.permute.xlu0 %382 }
 0x310   : > { %v385_v56 = vpop.permute.xlu1 %384 }
 0x311   : > { %v389_v57 = vsel %vm388_vm1, %v383_v55, %v385_v56  ;;  %v390_v58 = vsel %vm388_vm1, %v385_v56, %v383_v55 }
 0x312   : > { %v402_v59 = vmul.f32 %v395_v52, %v389_v57  ;;  %v403_v60 = vmul.f32 %v399_v53, %v390_v58 }
 0x314   : > { %v426_v63 = vcombine.low %v402_v59, %v403_v60  ;;  %v407_v1 = vpop.permute.xlu1 %406 }
 0x315   : > { %v409_v2 = vsel %vm408_vm2, %v405_v51, %v407_v1  ;;  %v410_v3 = vsel %vm408_vm2, %v407_v1, %v405_v51 }
 0x316   : > { %v422_v4 = vmul.f32 %v415_v61, %v410_v3  ;;  %v423_v5 = vmul.f32 %v419_v62, %v409_v2  ;;  %v428_v6 = vadd.f32 %v426_v63, %v1289_v44 }
 0x318   : > { %v431_v7 = vcombine.low %v422_v4, %v423_v5 }
 0x31a   : > { %v433_v8 = vadd.f32 %v431_v7, %v428_v6  ;;  %v1152_v6 = vmov 2  }
 0x31b   : > { %1024 = vset.pattern.permute.xlu0 %v1152_v6 }
 0x31c   : > { %437 = vrot.lane.b32.xlu1 %v433_v8, %s1150_s8  ;;  %v435_v9 = vcombine.high %v433_v8, %v433_v8 }
 0x31e   : > { %459 = vrot.lane.b32.xlu0 %v435_v9, %s1151_s9 }
 0x320   : > { %439 = vrot.lane.b32.xlu1 %v435_v9, %s1150_s8 }
 0x324   : > { %457 = vrot.lane.b32.xlu1 %v433_v8, %s1151_s9 }
 0x328   : > { %501 = vperm.xlu1 %1023, %v1281_v29  }
 0x38e   : > { %v438_v11 = vpop.permute.xlu1 %437 }
 0x390   : > { %v460_v23 = vpop.permute.xlu0 %459 }
 0x392   : > { %v440_v15 = vpop.permute.xlu1 %439 }
 0x393   : > { %v442_v16 = vsel %vm441_vm3, %v438_v11, %v440_v15  ;;  %v443_v17 = vsel %vm441_vm3, %v440_v15, %v438_v11  ;;  %v306_v15 = vld [vmem:[%s1406_s6] sm:$0xf] }
 0x394   : > { %v455_v19 = vmul.f32 %v448_v12, %v442_v16  ;;  %v456_v20 = vmul.f32 %v452_v13, %v443_v17 }
 0x396   : > { %v479_v25 = vcombine.low %v455_v19, %v456_v20  ;;  %v458_v26 = vpop.permute.xlu1 %457 }
 0x397   : > { %v462_v30 = vsel %vm461_vm4, %v458_v26, %v460_v23  ;;  %v463_v31 = vsel %vm461_vm4, %v460_v23, %v458_v26 }
 0x398   : > { %v475_v32 = vmul.f32 %v468_v21, %v463_v31  ;;  %v476_v33 = vmul.f32 %v472_v22, %v462_v30  ;;  %v481_v34 = vadd.f32 %v479_v25, %v433_v8  ;;  %v1153_v8 = vmov 3  }
 0x399   : > { %1025 = vset.pattern.permute.xlu1 %v1153_v8 }
 0x39a   : > { %v484_v35 = vcombine.low %v475_v32, %v476_v33 }
 0x39c   : > { %v486_v37 = vadd.f32 %v484_v35, %v481_v34 }
 0x39e   : > { %v498_v39 = vmul.f32 %v496_v36, %v486_v37 }
 0x3a0   : > { %v499_v40 = vsub.f32 %v498_v39, %v1289_v44 }
 0x3a2   : > { %v505_v41 = vcombine.high %v499_v40, %v499_v40 }
 0x3a3   : > { %v502_v42 = vpop.permute.xlu1 %501 }
 0x3a4   : > { %v507_v43 = vmul.f32 %v502_v42, %v499_v40  ;;  %v508_v45 = vmul.f32 %v505_v41, %v502_v42 }
 0x3a6   : > { %v511_v46 = vcombine.low %v507_v43, %v508_v45 }
 0x3a8   : > { %v1314_v47 = vadd.f32 %v511_v46, %v1268_v0 }
 0x3aa   : > { %v516_v48 = vcombine.high %v1314_v47, %v1314_v47  ;;  %v518_v49 = vsel %vm311_vm0, %v1314_v47, 0.0 }
 0x3ac   : > { %v519_v50 = vsel %vm311_vm0, %v516_v48, 0.0 }
 0x3ad   : > { %v520_v51 = vadd.f32 %v519_v50, %v518_v49 }
 0x3af   : > { %521 = vadd.xlane.f32.xlu0 %v520_v51 }
 0x438   : > { %v522_v52 = vpop.xlane.xlu0 %521 }
 0x439   : > { %v523_v44 = vrot.slane %v522_v52, 4 }
 0x43b   : > { %v524_v53 = vadd.f32 %v523_v44, %v522_v52 }
 0x43d   : > { %v525_v54 = vrot.slane %v524_v53, 2 }
 0x43f   : > { %v526_v55 = vadd.f32 %v525_v54, %v524_v53 }
 0x441   : > { %v527_v56 = vrot.slane %v526_v55, 1 }
 0x443   : > { %v528_v57 = vadd.f32 %v527_v56, %v526_v55 }
 0x445   : > { %953 = vpush %v528_v57 }
 0x476   : > { %s954_s19 = spop %953 }
 0x477   : > { %s530_s20 = smul.f32 0.0009765625, %s954_s19 }
 0x479   : > { %v531_v0 = vstv %s530_s20  ;;  %s549_s21 = smul.f32 %s530_s20, %s530_s20  ;;  %s1156_s20 = smov [#allocation6]  }
 0x47a   : > { %v532_v58 = vsub.f32 %v1314_v47, %v531_v0 }
 0x47b   : > { %s550_s22 = smul.f32 0.0, %s549_s21  ;;  %s1081_s21 = sshll.u32 %s1156_s20, 4  ;;  %s1082_s21 = int_to_ptr.vmem [resolvable:$false] %s1081_s21 }
 0x47c   : > { %v533_v59 = vmul.f32 %v532_v58, %v532_v58 }
 0x47e   : > { %v535_v60 = vcombine.high %v533_v59, %v533_v59  ;;  %v537_v61 = vsel %vm311_vm0, %v533_v59, 0.0 }
 0x480   : > { %v538_v62 = vsel %vm311_vm0, %v535_v60, 0.0 }
 0x481   : > { %v539_v63 = vadd.f32 %v538_v62, %v537_v61 }
 0x483   : > { %540 = vadd.xlane.f32.xlu1 %v539_v63 }
 0x494   : > { %573 = vperm.xlu1 %1025, %v1281_v29  }
 0x498   : > { %1026 = vset.pattern.permute.xlu1 %v1144_v24  ;;  %v305_v24 = vld [vmem:[%s1404_s4 + $0x8] sm:$0xff] }
 0x499   : > { %593 = vperm.xlu1 %1026, %v304_v14  }
 0x49d   : > { %598 = vperm.xlu1 %1026, %v305_v24  }
 0x4a1   : > { %768 = vperm.xlu1 %1026, %v306_v15  }
 0x4a5   : > { %1027 = vset.pattern.permute.xlu1 %v1154_v28 }
 0x4a6   : > { %818 = vperm.xlu1 %1027, %v1281_v29  }
 0x50c   : > { %v541_v1 = vpop.xlane.xlu1 %540 }
 0x50d   : > { %v542_v2 = vrot.slane %v541_v1, 4 }
 0x50f   : > { %v543_v3 = vadd.f32 %v542_v2, %v541_v1 }
 0x510   : > { %v574_v16 = vpop.permute.xlu1 %573 }
 0x511   : > { %v544_v4 = vrot.slane %v543_v3, 2  ;;  %v581_v19 = vrot.slane %v574_v16, %v1285_v38 }
 0x513   : > { %v545_v5 = vadd.f32 %v544_v4, %v543_v3 }
 0x515   : > { %v546_v7 = vrot.slane %v545_v5, 1 }
 0x517   : > { %v547_v9 = vadd.f32 %v546_v7, %v545_v5 }
 0x519   : > { %955 = vpush %v547_v9 }
 0x54a   : > { %s956_s23 = spop %955 }
 0x54b   : > { %s551_s29 = ssub.f32 %s956_s23, %s550_s22 }
 0x54d   : > { %s552_s8 = smul.f32 0.0009765625, %s551_s29  ;;  %s282_s29 = sand.u32 1, %s1133_s25  }
 0x54e   : > { %s830_s18 = scalar_lea.sflag [#allocation5], %s282_s29 }
 0x54f   : > { %s553_s9 = sadd.f32 1e-05, %s552_s8  ;;  %s921_s8 = sshll.u32 %s282_s29, 3 }
 0x551   : > { %v554_v10 = vstv %s553_s9  ;;  %s946_s9 = sshll.u32 %s1218_s28, 7  ;;  %s1083_s28 = scalar_lea.vmem %s1082_s21, 256 }
 0x552   : > { %1033 = vrsqrt.f32 %v554_v10  ;;  %s842_s17 = scalar_lea.hbm %s1407_s7, %s946_s9 }
 0x55f   : > { %v1034_v11 = vpop.eup %1033 }
 0x560   : > { %957 = vpush %v1034_v11 }
 0x591   : > { %s958_s13 = spop %957 }
 0x592   : > { %v557_v12 = vstv %s958_s13  ;;  %s284_s13 = scalar_lea.vmem [#allocation6], %s921_s8 }
 0x593   : > { %v558_v13 = vmul.f32 %v557_v12, %v1281_v29  ;;  %s844_s14 = sshll.u32 %s284_s13, 4  ;;  %s845_s14 = int_to_ptr.vmem [resolvable:$true] %s844_s14 }
 0x594   : > { %s1077_s19 = scalar_lea.vmem %s845_s14, 128  ;;  %p1084_p11 = scmp.lt.s32.totalorder %s845_s14, %s1082_s21 }
 0x595   : > { %561 = vperm.xlu0 %1024, %v558_v13   ;;  %p1078_p6 = scmp.ne.s32.totalorder %s845_s14, %s1077_s19  ;;  %p1085_p12 = scmp.lt.s32.totalorder %s1083_s28, %s1077_s19 }
 0x597   : > { %p1079_p9 = pnand %p1078_p6, %p1235_p5  ;;  %p1086_p13 = por %p1085_p12, %p1084_p11 }
 0x599   : > { %1028 = vset.pattern.permute.xlu0 %v1154_v28  ;;  %p1080_p10 = pneg %p1079_p9 }
 0x59b   : > { %p1087_p0 = pnand %p1086_p13, %p1080_p10 }
 0x610   : > { %v562_v17 = vpop.permute.xlu0 %561 }
 0x611   : > { %v569_v18 = vrot.slane %v562_v17, %v1285_v38  ;;  %v594_v38 = vpop.permute.xlu1 %593 }
 0x613   : > { %v571_v20 = vmul.f32 %v569_v18, %v532_v58 }
 0x615   : > { %v583_v21 = vadd.f32 %v581_v19, %v571_v20  ;;  %v599_v35 = vpop.permute.xlu1 %598 }
 0x617   : > { %v587_v22 = vcombine.high %v583_v21, %v583_v21  ;;  %v589_v23 = vpack.c.bf16 %v583_v21, %v583_v21 }
 0x619   : > { %v590_v25 = vpack.c.bf16 %v587_v22, %v587_v22  ;;  %v612_v26 = vsel %vm610_vm5, %v589_v23, 0 }
 0x61b   : > { %929 = vmatprep.subr.msk.bf16.mxu0 %vm610_vm5, %v590_v25 }
 0x61c   : > { %632 = vmatpush1.bf16.msra.mxu0 %v612_v26 }
 0x61f   : > { %930 = vmatmul.mubr.msk.bf16.vlgmr.msra.gmra.mxu0 %vm606_vm6, %v1030_v27 }
 0x6df   : > { %v651_v30 = vpop.f32.mrf.mxu0 }
 0x6e0   : > { %v1342_v31 = vadd.f32 %v651_v30, %v594_v38 }
 0x6e1   : > { %v653_v32 = vpop.f32.mrf.mxu0 }
 0x6e2   : > { %v668_v33 = vand.u32 2147483647, %v1342_v31  ;;  %v1345_v34 = vadd.f32 %v653_v32, %v594_v38  ;;  %vm660_vm7 = vcmp.ge.f32.partialorder %v1342_v31, 0.0 }
 0x6e3   : > { %v655_v36 = vpop.f32.mrf.mxu0 }
 0x6e4   : > { %v672_v37 = vmul.f32 0.70710677, %v668_v33  ;;  %v669_v39 = vand.u32 2147483647, %v1345_v34  ;;  %v1348_v40 = vadd.f32 %v655_v36, %v599_v35  ;;  %vm661_vm8 = vcmp.ge.f32.partialorder %v1345_v34, 0.0 }
 0x6e5   : > { %v657_v41 = vpop.f32.mrf.mxu0 }
 0x6e6   : > { %v676_v42 = vmul.f32 0.3275911, %v672_v37  ;;  %v673_v43 = vmul.f32 0.70710677, %v669_v39  ;;  %v670_v29 = vand.u32 2147483647, %v1348_v40  ;;  %v1351_v45 = vadd.f32 %v657_v41, %v599_v35 }
 0x6e7   : > { %v724_v56 = vsub.f32 0.0, %v672_v37  ;;  %vm662_vm9 = vcmp.ge.f32.partialorder %v1348_v40, 0.0 }
 0x6e8   : > { %v680_v46 = vadd.f32 1.0, %v676_v42  ;;  %v677_v48 = vmul.f32 0.3275911, %v673_v43  ;;  %v674_v49 = vmul.f32 0.70710677, %v670_v29  ;;  %v725_v57 = vsub.f32 0.0, %v673_v43 }
 0x6e9   : > { %v671_v50 = vand.u32 2147483647, %v1351_v45  ;;  %v728_v0 = vmul.f32 %v724_v56, %v672_v37  ;;  %vm663_vm10 = vcmp.ge.f32.partialorder %v1351_v45, 0.0 }
 0x6ea   : > { %1035 = vrcp.f32 %v680_v46  ;;  %v681_v51 = vadd.f32 1.0, %v677_v48  ;;  %v678_v52 = vmul.f32 0.3275911, %v674_v49  ;;  %v726_v58 = vsub.f32 0.0, %v674_v49 }
 0x6eb   : > { %v675_v44 = vmul.f32 0.70710677, %v671_v50  ;;  %v729_v60 = vmul.f32 %v725_v57, %v673_v43  ;;  %v732_v63 = vmul.f32 1.442695, %v728_v0  ;;  %v1155_v0 = vmov -1.0  }
 0x6ec   : > { %1037 = vrcp.f32 %v681_v51  ;;  %v682_v53 = vadd.f32 1.0, %v678_v52  ;;  %v730_v1 = vmul.f32 %v726_v58, %v674_v49  ;;  %v664_v58 = vsel %vm660_vm7, 1.0, %v1155_v0 }
 0x6ed   : > { %v679_v54 = vmul.f32 0.3275911, %v675_v44  ;;  %v727_v61 = vsub.f32 0.0, %v675_v44  ;;  %v734_v4 = vmul.f32 1.442695, %v729_v60 }
 0x6ee   : > { %1039 = vrcp.f32 %v682_v53  ;;  %v736_v9 = vmul.f32 1.442695, %v730_v1 }
 0x6ef   : > { %v683_v55 = vadd.f32 1.0, %v679_v54  ;;  %v731_v7 = vmul.f32 %v727_v61, %v675_v44  ;;  %v666_v61 = vsel %vm662_vm9, 1.0, %v1155_v0 }
 0x6f1   : > { %1041 = vrcp.f32 %v683_v55  ;;  %v738_v15 = vmul.f32 1.442695, %v731_v7 }
 0x6f2   : > { %1043 = vpow2.f32 %v732_v63 }
 0x6f3   : > { %1045 = vpow2.f32 %v734_v4  ;;  %v667_v4 = vsel %vm663_vm10, 1.0, %v1155_v0 }
 0x6f4   : > { %1047 = vpow2.f32 %v736_v9 }
 0x6f5   : > { %1049 = vpow2.f32 %v738_v15 }
 0x6f7   : > { %v1036_v59 = vpop.eup %1035 }
 0x6f8   : > { %v688_v62 = vmul.f32 1.0614054, %v1036_v59 }
 0x6f9   : > { %v1038_v2 = vpop.eup %1037 }
 0x6fa   : > { %v931_v3 = vadd.f32 -1.4531521, %v688_v62  ;;  %v689_v5 = vmul.f32 1.0614054, %v1038_v2 }
 0x6fb   : > { %v1040_v6 = vpop.eup %1039 }
 0x6fc   : > { %v696_v8 = vmul.f32 %v1036_v59, %v931_v3  ;;  %v932_v10 = vadd.f32 -1.4531521, %v689_v5  ;;  %v690_v11 = vmul.f32 1.0614054, %v1040_v6 }
 0x6fe   : > { %v700_v12 = vadd.f32 1.4214138, %v696_v8  ;;  %v1042_v13 = vpop.eup %1041  ;;  %v697_v14 = vmul.f32 %v1038_v2, %v932_v10  ;;  %v933_v24 = vadd.f32 -1.4531521, %v690_v11  ;;  %v754_v8 = vmul.f32 0.5, %v1348_v40 }
 0x6ff   : > { %v691_v16 = vmul.f32 1.0614054, %v1042_v13  ;;  %v1044_v41 = vpop.eup %1043  ;;  %v753_v10 = vmul.f32 0.5, %v1345_v34  ;;  %v755_v11 = vmul.f32 0.5, %v1351_v45  ;;  %v303_v40 = vld [vmem:[%s1405_s5] sm:$0x3]  ;;  %v769_v34 = vpop.permute.xlu1 %768 }
 0x700   : > { %v704_v17 = vmul.f32 %v1036_v59, %v700_v12  ;;  %v701_v18 = vadd.f32 1.4214138, %v697_v14  ;;  %v698_v19 = vmul.f32 %v1040_v6, %v933_v24  ;;  %v1046_v48 = vpop.eup %1045 }
 0x701   : > { %v934_v20 = vadd.f32 -1.4531521, %v691_v16  ;;  %v1048_v52 = vpop.eup %1047 }
 0x702   : > { %v935_v21 = vadd.f32 -0.28449672, %v704_v17  ;;  %v705_v22 = vmul.f32 %v1038_v2, %v701_v18  ;;  %v702_v23 = vadd.f32 1.4214138, %v698_v19  ;;  %v1050_v57 = vpop.eup %1049 }
 0x703   : > { %v699_v25 = vmul.f32 %v1042_v13, %v934_v20  ;;  %v819_v20 = vpop.permute.xlu1 %818 }
 0x704   : > { %v712_v26 = vmul.f32 %v1036_v59, %v935_v21  ;;  %v936_v27 = vadd.f32 -0.28449672, %v705_v22  ;;  %v706_v28 = vmul.f32 %v1040_v6, %v702_v23 }
 0x705   : > { %v703_v38 = vadd.f32 1.4214138, %v699_v25 }
 0x706   : > { %v716_v30 = vadd.f32 0.2548296, %v712_v26  ;;  %v713_v32 = vmul.f32 %v1038_v2, %v936_v27  ;;  %v937_v33 = vadd.f32 -0.28449672, %v706_v28 }
 0x707   : > { %v707_v35 = vmul.f32 %v1042_v13, %v703_v38 }
 0x708   : > { %v720_v36 = vmul.f32 %v1036_v59, %v716_v30  ;;  %v717_v37 = vadd.f32 0.2548296, %v713_v32  ;;  %v714_v39 = vmul.f32 %v1040_v6, %v937_v33  ;;  %v665_v59 = vsel %vm661_vm8, 1.0, %v1155_v0 }
 0x709   : > { %v938_v42 = vadd.f32 -0.28449672, %v707_v35 }
 0x70a   : > { %v721_v43 = vmul.f32 %v1038_v2, %v717_v37  ;;  %v718_v29 = vadd.f32 0.2548296, %v714_v39  ;;  %v740_v46 = vmul.f32 %v1044_v41, %v720_v36 }
 0x70b   : > { %v715_v49 = vmul.f32 %v1042_v13, %v938_v42 }
 0x70c   : > { %v741_v50 = vmul.f32 %v1046_v48, %v721_v43  ;;  %v722_v51 = vmul.f32 %v1040_v6, %v718_v29  ;;  %v744_v55 = vsub.f32 1.0, %v740_v46 }
 0x70d   : > { %v719_v44 = vadd.f32 0.2548296, %v715_v49 }
 0x70e   : > { %v745_v53 = vsub.f32 1.0, %v741_v50  ;;  %v742_v54 = vmul.f32 %v1048_v52, %v722_v51  ;;  %v748_v1 = vmul.f32 %v744_v55, %v664_v58 }
 0x70f   : > { %v723_v56 = vmul.f32 %v1042_v13, %v719_v44  ;;  %v752_v13 = vmul.f32 0.5, %v1342_v31 }
 0x710   : > { %v746_v60 = vsub.f32 1.0, %v742_v54  ;;  %v749_v63 = vmul.f32 %v745_v53, %v665_v59  ;;  %v756_v9 = vadd.f32 1.0, %v748_v1 }
 0x711   : > { %v743_v62 = vmul.f32 %v1050_v57, %v723_v56 }
 0x712   : > { %v750_v2 = vmul.f32 %v746_v60, %v666_v61  ;;  %v757_v7 = vadd.f32 1.0, %v749_v63  ;;  %v760_v16 = vmul.f32 %v756_v9, %v752_v13 }
 0x713   : > { %v747_v3 = vsub.f32 1.0, %v743_v62 }
 0x714   : > { %v758_v5 = vadd.f32 1.0, %v750_v2  ;;  %v761_v24 = vmul.f32 %v757_v7, %v753_v10 }
 0x715   : > { %v751_v6 = vmul.f32 %v747_v3, %v667_v4 }
 0x716   : > { %v762_v14 = vmul.f32 %v758_v5, %v754_v8 }
 0x717   : > { %v759_v12 = vadd.f32 1.0, %v751_v6 }
 0x718   : > { %v764_v18 = vpack.c.bf16 %v762_v14, %v760_v16 }
 0x719   : > { %v763_v15 = vmul.f32 %v759_v12, %v755_v11 }
 0x71b   : > { %v765_v17 = vpack.c.bf16 %v763_v15, %v761_v24 }
 0x71d   : > { %789 = vmatprep.subr.bf16.mxu1 %v765_v17 }
 0x71e   : > { %790 = vmatpush1.bf16.msra.mxu1 %v764_v18 }
 0x721   : > { %939 = vmatmul.mubr.msk.bf16.vlgmr.msra.gmra.mxu1 %vm771_vm11, %v303_v40 }
 0x7e1   : > { %v809_v45 = vpop.f32.mrf.mxu1 }
 0x7e2   : > { %v810_v31 = vadd.f32 %v809_v45, %v769_v34 }
 0x7e3   : > { %v811_v19 = vpop.f32.mrf.mxu1 }
 0x7e4   : > { %v812_v21 = vadd.f32 %v811_v19, %v769_v34  ;;  %v821_v23 = vmul.f32 %v819_v20, %v810_v31 }
 0x7e5   : > { %v813_v22 = vpop.f32.mrf.mxu1 }
 0x7e6   : > { %v822_v25 = vmul.f32 %v819_v20, %v812_v21 }
 0x7e7   : > { %v814_v26 = vpop.f32.mrf.mxu1 }
 0x7e8   : > { %v825_v27 = vcombine.low %v821_v23, %v822_v25 }
 0x7ea   : > { %v827_v28 = vadd.f32 %v825_v27, %v1314_v47 }
 0x7ec   : > { %828 = vst [vmem:[%s284_s13] sm:$0xff] %v827_v28 }
 0x7ed   : > { %1090 = shalt.err (!%p1087_p0)
}
 0x7ee   : > { %s1091_s22 = scalar_lea.hbm %s842_s17, 128  ;;  %s1095_s8 = scalar_lea.hbm %s1407_s7, 256 }
 0x7ef   : > { %p1092_p1 = scmp.ne.s32.totalorder %s842_s17, %s1091_s22  ;;  %p1096_p4 = scmp.lt.s32.totalorder %s842_s17, %s1407_s7 }
 0x7f0   : > { %p1097_p7 = scmp.lt.s32.totalorder %s1095_s8, %s1091_s22 }
 0x7f1   : > { %p1093_p2 = pnand %p1092_p1, %p1235_p5 }
 0x7f2   : > { %p1098_p8 = por %p1097_p7, %p1096_p4 }
 0x7f3   : > { %p1094_p3 = pneg %p1093_p2 }
 0x7f5   : > { %p1099_p6 = pnand %p1098_p8, %p1094_p3 }
 0x7f7   : > { %1102 = shalt.err (!%p1099_p6)
}
 0x7f8   : > { %963 = dma.vmem_to_hbm [thread:$0]  (%p1235_p5), %s845_s14, 128, %s842_s17, %s830_s18  }
 0x7f9 PF: > { %p975_p9 = scmp.ge.s32.totalorder %s1141_s27, 2  ;;  %s856_s15 = sand.u32 1, %s1129_s24  }
 0x7fa   : > { %p1411_p10 = scmp.ne.s32.totalorder %s1409_s12, 0  ;;  %s857_s16 = scalar_lea.sflag [#allocation5], %s856_s15 }
 0x7fc   : > { %p970_p11 = pnand %p975_p9, %p1411_p10 }
 0x7fe   : > { %p971_p12 = pneg %p970_p11 }
 0x800   : > { %1124 = dma.done.wait (%p971_p12), %s857_s16, 128  }
 0x801   : > { %1126 = vsyncadd (%p971_p12), %s857_s16, 4294967168  ;;  %p18_p13 = scmp.ge.s32.totalorder %s1222_s30, 4   ;;  %s1412_s24 = smov %s1133_s25 }
 0x802   : > { %s1413_s25 = smov %s1137_s26  ;;  %s1414_s26 = smov %s1233_s10 }
 0x803   : > { %s1415_s27 = smov %s1222_s30  ;;  %20 = sbr.rel (!%p18_p13) target bundleno = 4 (0x4), region = 92 }
 0x808   :  { %862 = vsyncpa [#allocation4], 1 }
 0x809   :  { %864 = vsyncpa [#allocation4 + $0x1], 1 }
 0x80a   :  { %865 = vsyncpa [#allocation5], 1 }
 0x80b   :  { %867 = vsyncpa [#allocation5 + $0x1], 1 }

// kernel: tpu_custom_call.1
= control target key start
LH: loop header
LB: loop body
LE: loop exit
PB: predicated region body
PF: predicated region fallthrough
CT: control target
= control target key end

     0   :  { %12 = vsyncpa [#allocation4], 0  ;;  %s1400_s0 = inlined_call_operand.vmem [shape: f32[2,4,256], index: 0, kind: input, shape index: {}]   ;;  %s1401_s1 = inlined_call_operand.hbm [shape: f32[4,6], index: 1, kind: input, shape index: {}]   ;;  %s1402_s2 = inlined_call_operand.vmem [shape: f32[6,256], index: 2, kind: input, shape index: {}]   ;;  %s1403_s3 = inlined_call_operand.vmem [shape: bf16[16,4], index: 3, kind: input, shape index: {}]   ;;  %s1404_s4 = inlined_call_operand.vmem [shape: f32[16,1], index: 4, kind: input, shape index: {}]   ;;  %s1405_s5 = inlined_call_operand.vmem [shape: bf16[4,16], index: 5, kind: input, shape index: {}]   ;;  %s1406_s6 = inlined_call_operand.vmem [shape: f32[4,1], index: 6, kind: input, shape index: {}]   ;;  %s1407_s7 = inlined_call_operand.hbm [shape: f32[2,4,256], index: 7, kind: output, shape index: {}]  }
   0x1   :  { %13 = vsyncpa [#allocation5], 0 }
   0x2   :  { %15 = vsyncpa [#allocation5 + $0x1], 0  ;;  %s1197_s24 = smov 0   ;;  %s1199_s25 = smov 0  }
   0x3   :  { %s1201_s26 = smov 0   ;;  %s1203_s27 = smov 0  }
   0x4 LB: > { %s1218_s28 = sadd.s32 4294967295, %s1141_s27   ;;  %s915_s29 = sadd.s32 4294967294, %s1141_s27   ;;  %s1141_s27 = sphi %s1203_s27, %s1415_s27   ;;  %s1137_s26 = sphi %s1201_s26, %s1414_s26   ;;  %s1133_s25 = sphi %s1199_s25, %s1413_s25   ;;  %s1129_s24 = sphi %s1197_s24, %s1412_s24  }
   0x5   : > { %s1222_s30 = sadd.s32 1, %s1141_s27   ;;  %s180_s8 = sadd.s32 1, %s1137_s26 }
   0x6   : > { %s177_s9 = ssub.s32 %s1141_s27, %s1222_s30  ;;  %p190_p0 = scmp.ne.s32.totalorder %s1137_s26, %s1133_s25 }
   0x7   : > { %p178_p1 = scmp.eq.s32.totalorder %s177_s9, 0  ;;  %p191_p2 = scmp.eq.s32.totalorder %s1218_s28, 1 }
   0x8   : > { %p196_p3 = scmp.ne.s32.totalorder %s1133_s25, %s1129_s24  ;;  %p197_p4 = scmp.eq.s32.totalorder %s915_s29, 1 }
   0x9   : > { %s1233_s10 = scalar_select %p178_p1, %s1137_s26, %s180_s8  }
   0xa   : > { %p1235_p5 = por %p191_p2, %p190_p0  ;;  %p1239_p6 = por %p197_p4, %p196_p3 }
   0xb   : > { %p916_p7 = scmp.ge.s32.totalorder %s1141_s27, 1  ;;  %p204_p8 = scmp.lt.s32.totalorder %s1141_s27, 3 }
   0xc   : > { %s1409_s12 = scalar_select %p1239_p6, 1, 0 }
   0xd   : > { %p973_p9 = scmp.eq.s32.totalorder %s1218_s28, 0  ;;  %p1246_p10 = pnand %p916_p7, %p204_p8 }
   0xe   : > { %s1143_s14 = smov [#allocation3]  }
   0xf   : > { %s217_s15 = sshll.u32 %s1143_s14, 4  ;;  %p965_p11 = pneg %p1246_p10  ;;  %s218_s15 = int_to_ptr.vmem [resolvable:$true] %s217_s15 }
  0x10   : > { %s1062_s16 = scalar_lea.vmem %s218_s15, 64  ;;  %p1070_p3 = scmp.lt.s32.totalorder %s218_s15, %s218_s15 }
  0x11   : > { %p966_p12 = pnand %p973_p9, %p965_p11  ;;  %p1063_p0 = scmp.ne.s32.totalorder %s218_s15, %s1062_s16 }
  0x12   : > { %p1071_p4 = scmp.lt.s32.totalorder %s1062_s16, %s1062_s16 }
  0x13   : > { %p1053_p13 = pneg %p966_p12 }
  0x14   : > { %p1072_p6 = por %p1071_p4, %p1070_p3 }
  0x15   : > { %p1065_p1 = pnand %p1063_p0, %p1053_p13 }
  0x17   : > { %p1066_p2 = pneg %p1065_p1 }
  0x19   : > { %p1073_p7 = pnand %p1072_p6, %p1066_p2 }
  0x1b   : > { %1076 = shalt.err (!%p1073_p7)
}
  0x1c   : > { %968 = dma.hbm_to_vmem [thread:$0]  (!%p966_p12), %s1401_s1, 64, %s218_s15, [#allocation4]  }
  0x1d   : > { %253 = sbr.rel (%p1246_p10) target bundleno = 2041 (0x7f9), region = 48 }
  0x22   : > { %1120 = dma.done.wait (%p973_p9), [#allocation4], 64  }
  0x23   : > { %1122 = vsyncadd (%p973_p9), [#allocation4], 4294967232  ;;  %p285_p8 = scmp.lt.s32.totalorder %s1218_s28, 1  ;;  %vm311_vm0 = vcmask 1043456   ;;  %v1144_v24 = vmov 0   ;;  %v1145_v32 = vmov 1   ;;  %v360_v35 = vlaneseq }
  0x24   : > { %1021 = vset.pattern.permute.xlu1 %v1144_v24  ;;  %649 = vmatprep.mubr.bf16.mxu0 %v1144_v24  ;;  %v1281_v29 = vld [vmem:[#allocation3] sm:$0xf]  ;;  %v1146_v33 = vmov 839922192   ;;  %v1149_v46 = vmov 4   ;;  %vm610_vm5 = vcmask 1041408  }
  0x25   : > { %s286_s19 = scalar_select %p285_p8, %s1218_s28, 1  ;;  %807 = vmatprep.mubr.bf16.mxu1 %v1144_v24  ;;  %v358_v34 = vunpack.c.l.s4 %v1146_v33  ;;  %v361_v37 = vshrl.u32 %v360_v35, 7  ;;  %v387_v47 = vand.u32 127, %v360_v35  ;;  %v292_v50 = vld [vmem:[%s1402_s2] ss:$8 sm:$0x3] }
  0x26   : > { %v924_v54 = vld [vmem:[%s1402_s2 + $0x1] ss:$8 sm:$0x3]  ;;  %vm606_vm6 = vcmask 31744   ;;  %vm771_vm11 = vcmask 130048  }
  0x27   : > { %s945_s20 = sshll.u32 %s286_s19, 3  ;;  %v359_v36 = vunpack.c.0.s8 %v358_v34  ;;  %s1147_s19 = smov 1   ;;  %v394_v48 = vsub.s32 0, %v361_v37  ;;  %v398_v49 = vsub.s32 1, %v361_v37  ;;  %vm388_vm1 = vcmp.lt.s32.totalorder %v387_v47, 127 }
  0x28   : > { %s289_s23 = scalar_lea.vmem %s1400_s0, %s945_s20  ;;  %s1148_s20 = smov 127   ;;  %vm408_vm2 = vcmp.lt.s32.totalorder %v387_v47, 1  ;;  %vm441_vm3 = vcmp.lt.s32.totalorder %v387_v47, 112  ;;  %vm461_vm4 = vcmp.lt.s32.totalorder %v387_v47, 16 }
  0x29   : > { %v1268_v0 = vld [vmem:[%s289_s23] sm:$0xff]  ;;  %v1285_v38 = vsub.s32 %v359_v36, %v361_v37  ;;  %v395_v52 = vrot.slane %v292_v50, %v394_v48  ;;  %v399_v53 = vrot.slane %v292_v50, %v398_v49  ;;  %v415_v61 = vrot.slane %v924_v54, %v394_v48 }
  0x2a   : > { %v309_v1 = vcombine.high %v1268_v0, %v1268_v0  ;;  %v312_v2 = vsel %vm311_vm0, %v1268_v0, 0.0  ;;  %v419_v62 = vrot.slane %v924_v54, %v398_v49 }
  0x2c   : > { %v313_v3 = vsel %vm311_vm0, %v309_v1, 0.0 }
  0x2d   : > { %v314_v4 = vadd.f32 %v313_v3, %v312_v2 }
  0x2f   : > { %315 = vadd.xlane.f32.xlu0 %v314_v4 }
  0xb8   : > { %v316_v5 = vpop.xlane.xlu0 %315 }
  0xb9   : > { %v317_v6 = vrot.slane %v316_v5, 4 }
  0xbb   : > { %v318_v7 = vadd.f32 %v317_v6, %v316_v5 }
  0xbd   : > { %v319_v8 = vrot.slane %v318_v7, 2 }
  0xbf   : > { %v320_v9 = vadd.f32 %v319_v8, %v318_v7 }
  0xc1   : > { %v321_v10 = vrot.slane %v320_v9, 1 }
  0xc3   : > { %v322_v11 = vadd.f32 %v321_v10, %v320_v9  ;;  %v925_v10 = vld [vmem:[%s1402_s2 + $0x2] ss:$8 sm:$0x3] }
  0xc5   : > { %947 = vpush %v322_v11 }
  0xf6   : > { %s948_s29 = spop %947 }
  0xf7   : > { %s324_s8 = smul.f32 0.0009765625, %s948_s29 }
  0xf9   : > { %v325_v12 = vstv %s324_s8  ;;  %s343_s9 = smul.f32 %s324_s8, %s324_s8  ;;  %s1150_s8 = smov 112  }
  0xfa   : > { %v326_v13 = vsub.f32 %v1268_v0, %v325_v12  ;;  %v448_v12 = vrot.slane %v925_v10, %v394_v48 }
  0xfb   : > { %s344_s13 = smul.f32 0.0, %s343_s9  ;;  %s1151_s9 = smov 16  }
  0xfc   : > { %v327_v14 = vmul.f32 %v326_v13, %v326_v13 }
  0xfe   : > { %v329_v15 = vcombine.high %v327_v14, %v327_v14  ;;  %v331_v16 = vsel %vm311_vm0, %v327_v14, 0.0  ;;  %v926_v14 = vld [vmem:[%s1402_s2 + $0x3] ss:$8 sm:$0x3] }
 0x100   : > { %v332_v17 = vsel %vm311_vm0, %v329_v15, 0.0 }
 0x101   : > { %v333_v18 = vadd.f32 %v332_v17, %v331_v16 }
 0x103   : > { %334 = vadd.xlane.f32.xlu0 %v333_v18  ;;  %v927_v18 = vld [vmem:[%s1402_s2 + $0x4] ss:$8 sm:$0x3] }
 0x18c   : > { %v335_v19 = vpop.xlane.xlu0 %334 }
 0x18d   : > { %v336_v20 = vrot.slane %v335_v19, 4 }
 0x18f   : > { %v337_v21 = vadd.f32 %v336_v20, %v335_v19 }
 0x191   : > { %v338_v22 = vrot.slane %v337_v21, 2 }
 0x193   : > { %v339_v23 = vadd.f32 %v338_v22, %v337_v21  ;;  %v468_v21 = vrot.slane %v926_v14, %v394_v48  ;;  %v472_v22 = vrot.slane %v926_v14, %v398_v49  ;;  %v304_v14 = vld [vmem:[%s1404_s4] sm:$0xff] }
 0x195   : > { %v340_v25 = vrot.slane %v339_v23, 1 }
 0x197   : > { %v341_v26 = vadd.f32 %v340_v25, %v339_v23 }
 0x199   : > { %949 = vpush %v341_v26 }
 0x1ca   : > { %s950_s14 = spop %949 }
 0x1cb   : > { %s345_s15 = ssub.f32 %s950_s14, %s344_s13 }
 0x1cd   : > { %s346_s16 = smul.f32 0.0009765625, %s345_s15 }
 0x1cf   : > { %s347_s17 = sadd.f32 1e-05, %s346_s16 }
 0x1d1   : > { %v348_v27 = vstv %s347_s17 }
 0x1d2   : > { %1031 = vrsqrt.f32 %v348_v27  ;;  %v491_v27 = vrot.slane %v927_v18, %v394_v48 }
 0x1df   : > { %v1032_v28 = vpop.eup %1031 }
 0x1e0   : > { %951 = vpush %v1032_v28  ;;  %v495_v28 = vrot.slane %v927_v18, %v398_v49 }
 0x1e2   : > { %v496_v36 = vcombine.low %v491_v27, %v495_v28  ;;  %v1030_v27 = vld [vmem:[%s1403_s3] sm:$0xff]   ;;  %v1154_v28 = vmov 5  }
 0x211   : > { %s952_s18 = spop %951 }
 0x212   : > { %v351_v30 = vstv %s952_s18 }
 0x213   : > { %v352_v31 = vmul.f32 %v351_v30, %v1281_v29 }
 0x215   : > { %355 = vperm.xlu1 %1021, %v352_v31  }
 0x219   : > { %1022 = vset.pattern.permute.xlu1 %v1145_v32 }
 0x21a   : > { %368 = vperm.xlu1 %1022, %v1281_v29  }
 0x21e   : > { %1023 = vset.pattern.permute.xlu1 %v1149_v46 }
 0x290   : > { %v356_v39 = vpop.permute.xlu1 %355 }
 0x291   : > { %v363_v40 = vrot.slane %v356_v39, %v1285_v38 }
 0x293   : > { %v365_v42 = vmul.f32 %v363_v40, %v326_v13  ;;  %v452_v13 = vrot.slane %v925_v10, %v398_v49 }
 0x295   : > { %v369_v41 = vpop.permute.xlu1 %368 }
 0x296   : > { %v376_v43 = vrot.slane %v369_v41, %v1285_v38 }
 0x298   : > { %v1289_v44 = vadd.f32 %v376_v43, %v365_v42 }
 0x29a   : > { %404 = vrot.lane.b32.xlu1 %v1289_v44, %s1147_s19  ;;  %382 = vrot.lane.b32.xlu0 %v1289_v44, %s1148_s20  ;;  %v380_v45 = vcombine.high %v1289_v44, %v1289_v44 }
 0x29e   : > { %384 = vrot.lane.b32.xlu1 %v380_v45, %s1148_s20 }
 0x2a2   : > { %406 = vrot.lane.b32.xlu1 %v380_v45, %s1147_s19 }
 0x30c   : > { %v405_v51 = vpop.permute.xlu1 %404  ;;  %v383_v55 = vpop.permute.xlu0 %382 }
 0x310   : > { %v385_v56 = vpop.permute.xlu1 %384 }
 0x311   : > { %v389_v57 = vsel %vm388_vm1, %v383_v55, %v385_v56  ;;  %v390_v58 = vsel %vm388_vm1, %v385_v56, %v383_v55 }
 0x312   : > { %v402_v59 = vmul.f32 %v395_v52, %v389_v57  ;;  %v403_v60 = vmul.f32 %v399_v53, %v390_v58 }
 0x314   : > { %v426_v63 = vcombine.low %v402_v59, %v403_v60  ;;  %v407_v1 = vpop.permute.xlu1 %406 }
 0x315   : > { %v409_v2 = vsel %vm408_vm2, %v405_v51, %v407_v1  ;;  %v410_v3 = vsel %vm408_vm2, %v407_v1, %v405_v51 }
 0x316   : > { %v422_v4 = vmul.f32 %v415_v61, %v410_v3  ;;  %v423_v5 = vmul.f32 %v419_v62, %v409_v2  ;;  %v428_v6 = vadd.f32 %v426_v63, %v1289_v44 }
 0x318   : > { %v431_v7 = vcombine.low %v422_v4, %v423_v5 }
 0x31a   : > { %v433_v8 = vadd.f32 %v431_v7, %v428_v6  ;;  %v1152_v6 = vmov 2  }
 0x31b   : > { %1024 = vset.pattern.permute.xlu0 %v1152_v6 }
 0x31c   : > { %437 = vrot.lane.b32.xlu1 %v433_v8, %s1150_s8  ;;  %v435_v9 = vcombine.high %v433_v8, %v433_v8 }
 0x31e   : > { %459 = vrot.lane.b32.xlu0 %v435_v9, %s1151_s9 }
 0x320   : > { %439 = vrot.lane.b32.xlu1 %v435_v9, %s1150_s8 }
 0x324   : > { %457 = vrot.lane.b32.xlu1 %v433_v8, %s1151_s9 }
 0x328   : > { %501 = vperm.xlu1 %1023, %v1281_v29  }
 0x38e   : > { %v438_v11 = vpop.permute.xlu1 %437 }
 0x390   : > { %v460_v23 = vpop.permute.xlu0 %459 }
 0x392   : > { %v440_v15 = vpop.permute.xlu1 %439 }
 0x393   : > { %v442_v16 = vsel %vm441_vm3, %v438_v11, %v440_v15  ;;  %v443_v17 = vsel %vm441_vm3, %v440_v15, %v438_v11  ;;  %v306_v15 = vld [vmem:[%s1406_s6] sm:$0xf] }
 0x394   : > { %v455_v19 = vmul.f32 %v448_v12, %v442_v16  ;;  %v456_v20 = vmul.f32 %v452_v13, %v443_v17 }
 0x396   : > { %v479_v25 = vcombine.low %v455_v19, %v456_v20  ;;  %v458_v26 = vpop.permute.xlu1 %457 }
 0x397   : > { %v462_v30 = vsel %vm461_vm4, %v458_v26, %v460_v23  ;;  %v463_v31 = vsel %vm461_vm4, %v460_v23, %v458_v26 }
 0x398   : > { %v475_v32 = vmul.f32 %v468_v21, %v463_v31  ;;  %v476_v33 = vmul.f32 %v472_v22, %v462_v30  ;;  %v481_v34 = vadd.f32 %v479_v25, %v433_v8  ;;  %v1153_v8 = vmov 3  }
 0x399   : > { %1025 = vset.pattern.permute.xlu1 %v1153_v8 }
 0x39a   : > { %v484_v35 = vcombine.low %v475_v32, %v476_v33 }
 0x39c   : > { %v486_v37 = vadd.f32 %v484_v35, %v481_v34 }
 0x39e   : > { %v498_v39 = vmul.f32 %v496_v36, %v486_v37 }
 0x3a0   : > { %v499_v40 = vsub.f32 %v498_v39, %v1289_v44 }
 0x3a2   : > { %v505_v41 = vcombine.high %v499_v40, %v499_v40 }
 0x3a3   : > { %v502_v42 = vpop.permute.xlu1 %501 }
 0x3a4   : > { %v507_v43 = vmul.f32 %v502_v42, %v499_v40  ;;  %v508_v45 = vmul.f32 %v505_v41, %v502_v42 }
 0x3a6   : > { %v511_v46 = vcombine.low %v507_v43, %v508_v45 }
 0x3a8   : > { %v1314_v47 = vadd.f32 %v511_v46, %v1268_v0 }
 0x3aa   : > { %v516_v48 = vcombine.high %v1314_v47, %v1314_v47  ;;  %v518_v49 = vsel %vm311_vm0, %v1314_v47, 0.0 }
 0x3ac   : > { %v519_v50 = vsel %vm311_vm0, %v516_v48, 0.0 }
 0x3ad   : > { %v520_v51 = vadd.f32 %v519_v50, %v518_v49 }
 0x3af   : > { %521 = vadd.xlane.f32.xlu0 %v520_v51 }
 0x438   : > { %v522_v52 = vpop.xlane.xlu0 %521 }
 0x439   : > { %v523_v44 = vrot.slane %v522_v52, 4 }
 0x43b   : > { %v524_v53 = vadd.f32 %v523_v44, %v522_v52 }
 0x43d   : > { %v525_v54 = vrot.slane %v524_v53, 2 }
 0x43f   : > { %v526_v55 = vadd.f32 %v525_v54, %v524_v53 }
 0x441   : > { %v527_v56 = vrot.slane %v526_v55, 1 }
 0x443   : > { %v528_v57 = vadd.f32 %v527_v56, %v526_v55 }
 0x445   : > { %953 = vpush %v528_v57 }
 0x476   : > { %s954_s19 = spop %953 }
 0x477   : > { %s530_s20 = smul.f32 0.0009765625, %s954_s19 }
 0x479   : > { %v531_v0 = vstv %s530_s20  ;;  %s549_s21 = smul.f32 %s530_s20, %s530_s20  ;;  %s1156_s20 = smov [#allocation6]  }
 0x47a   : > { %v532_v58 = vsub.f32 %v1314_v47, %v531_v0 }
 0x47b   : > { %s550_s22 = smul.f32 0.0, %s549_s21  ;;  %s1081_s21 = sshll.u32 %s1156_s20, 4  ;;  %s1082_s21 = int_to_ptr.vmem [resolvable:$false] %s1081_s21 }
 0x47c   : > { %v533_v59 = vmul.f32 %v532_v58, %v532_v58 }
 0x47e   : > { %v535_v60 = vcombine.high %v533_v59, %v533_v59  ;;  %v537_v61 = vsel %vm311_vm0, %v533_v59, 0.0 }
 0x480   : > { %v538_v62 = vsel %vm311_vm0, %v535_v60, 0.0 }
 0x481   : > { %v539_v63 = vadd.f32 %v538_v62, %v537_v61 }
 0x483   : > { %540 = vadd.xlane.f32.xlu1 %v539_v63 }
 0x494   : > { %573 = vperm.xlu1 %1025, %v1281_v29  }
 0x498   : > { %1026 = vset.pattern.permute.xlu1 %v1144_v24  ;;  %v305_v24 = vld [vmem:[%s1404_s4 + $0x8] sm:$0xff] }
 0x499   : > { %593 = vperm.xlu1 %1026, %v304_v14  }
 0x49d   : > { %598 = vperm.xlu1 %1026, %v305_v24  }
 0x4a1   : > { %768 = vperm.xlu1 %1026, %v306_v15  }
 0x4a5   : > { %1027 = vset.pattern.permute.xlu1 %v1154_v28 }
 0x4a6   : > { %818 = vperm.xlu1 %1027, %v1281_v29  }
 0x50c   : > { %v541_v1 = vpop.xlane.xlu1 %540 }
 0x50d   : > { %v542_v2 = vrot.slane %v541_v1, 4 }
 0x50f   : > { %v543_v3 = vadd.f32 %v542_v2, %v541_v1 }
 0x510   : > { %v574_v16 = vpop.permute.xlu1 %573 }
 0x511   : > { %v544_v4 = vrot.slane %v543_v3, 2  ;;  %v581_v19 = vrot.slane %v574_v16, %v1285_v38 }
 0x513   : > { %v545_v5 = vadd.f32 %v544_v4, %v543_v3 }
 0x515   : > { %v546_v7 = vrot.slane %v545_v5, 1 }
 0x517   : > { %v547_v9 = vadd.f32 %v546_v7, %v545_v5 }
 0x519   : > { %955 = vpush %v547_v9 }
 0x54a   : > { %s956_s23 = spop %955 }
 0x54b   : > { %s551_s29 = ssub.f32 %s956_s23, %s550_s22 }
 0x54d   : > { %s552_s8 = smul.f32 0.0009765625, %s551_s29  ;;  %s282_s29 = sand.u32 1, %s1133_s25  }
 0x54e   : > { %s830_s18 = scalar_lea.sflag [#allocation5], %s282_s29 }
 0x54f   : > { %s553_s9 = sadd.f32 1e-05, %s552_s8  ;;  %s921_s8 = sshll.u32 %s282_s29, 3 }
 0x551   : > { %v554_v10 = vstv %s553_s9  ;;  %s946_s9 = sshll.u32 %s1218_s28, 7  ;;  %s1083_s28 = scalar_lea.vmem %s1082_s21, 256 }
 0x552   : > { %1033 = vrsqrt.f32 %v554_v10  ;;  %s842_s17 = scalar_lea.hbm %s1407_s7, %s946_s9 }
 0x55f   : > { %v1034_v11 = vpop.eup %1033 }
 0x560   : > { %957 = vpush %v1034_v11 }
 0x591   : > { %s958_s13 = spop %957 }
 0x592   : > { %v557_v12 = vstv %s958_s13  ;;  %s284_s13 = scalar_lea.vmem [#allocation6], %s921_s8 }
 0x593   : > { %v558_v13 = vmul.f32 %v557_v12, %v1281_v29  ;;  %s844_s14 = sshll.u32 %s284_s13, 4  ;;  %s845_s14 = int_to_ptr.vmem [resolvable:$true] %s844_s14 }
 0x594   : > { %s1077_s19 = scalar_lea.vmem %s845_s14, 128  ;;  %p1084_p11 = scmp.lt.s32.totalorder %s845_s14, %s1082_s21 }
 0x595   : > { %561 = vperm.xlu0 %1024, %v558_v13   ;;  %p1078_p6 = scmp.ne.s32.totalorder %s845_s14, %s1077_s19  ;;  %p1085_p12 = scmp.lt.s32.totalorder %s1083_s28, %s1077_s19 }
 0x597   : > { %p1079_p9 = pnand %p1078_p6, %p1235_p5  ;;  %p1086_p13 = por %p1085_p12, %p1084_p11 }
 0x599   : > { %1028 = vset.pattern.permute.xlu0 %v1154_v28  ;;  %p1080_p10 = pneg %p1079_p9 }
 0x59b   : > { %p1087_p0 = pnand %p1086_p13, %p1080_p10 }
 0x610   : > { %v562_v17 = vpop.permute.xlu0 %561 }
 0x611   : > { %v569_v18 = vrot.slane %v562_v17, %v1285_v38  ;;  %v594_v38 = vpop.permute.xlu1 %593 }
 0x613   : > { %v571_v20 = vmul.f32 %v569_v18, %v532_v58 }
 0x615   : > { %v583_v21 = vadd.f32 %v581_v19, %v571_v20  ;;  %v599_v35 = vpop.permute.xlu1 %598 }
 0x617   : > { %v587_v22 = vcombine.high %v583_v21, %v583_v21  ;;  %v589_v23 = vpack.c.bf16 %v583_v21, %v583_v21 }
 0x619   : > { %v590_v25 = vpack.c.bf16 %v587_v22, %v587_v22  ;;  %v612_v26 = vsel %vm610_vm5, %v589_v23, 0 }
 0x61b   : > { %929 = vmatprep.subr.msk.bf16.mxu0 %vm610_vm5, %v590_v25 }
 0x61c   : > { %632 = vmatpush1.bf16.msra.mxu0 %v612_v26 }
 0x61f   : > { %930 = vmatmul.mubr.msk.bf16.vlgmr.msra.gmra.mxu0 %vm606_vm6, %v1030_v27 }
 0x6df   : > { %v651_v30 = vpop.f32.mrf.mxu0 }
 0x6e0   : > { %v1342_v31 = vadd.f32 %v651_v30, %v594_v38 }
 0x6e1   : > { %v653_v32 = vpop.f32.mrf.mxu0 }
 0x6e2   : > { %v668_v33 = vand.u32 2147483647, %v1342_v31  ;;  %v1345_v34 = vadd.f32 %v653_v32, %v594_v38  ;;  %vm660_vm7 = vcmp.ge.f32.partialorder %v1342_v31, 0.0 }
 0x6e3   : > { %v655_v36 = vpop.f32.mrf.mxu0 }
 0x6e4   : > { %v672_v37 = vmul.f32 0.70710677, %v668_v33  ;;  %v669_v39 = vand.u32 2147483647, %v1345_v34  ;;  %v1348_v40 = vadd.f32 %v655_v36, %v599_v35  ;;  %vm661_vm8 = vcmp.ge.f32.partialorder %v1345_v34, 0.0 }
 0x6e5   : > { %v657_v41 = vpop.f32.mrf.mxu0 }
 0x6e6   : > { %v676_v42 = vmul.f32 0.3275911, %v672_v37  ;;  %v673_v43 = vmul.f32 0.70710677, %v669_v39  ;;  %v670_v29 = vand.u32 2147483647, %v1348_v40  ;;  %v1351_v45 = vadd.f32 %v657_v41, %v599_v35 }
 0x6e7   : > { %v724_v56 = vsub.f32 0.0, %v672_v37  ;;  %vm662_vm9 = vcmp.ge.f32.partialorder %v1348_v40, 0.0 }
 0x6e8   : > { %v680_v46 = vadd.f32 1.0, %v676_v42  ;;  %v677_v48 = vmul.f32 0.3275911, %v673_v43  ;;  %v674_v49 = vmul.f32 0.70710677, %v670_v29  ;;  %v725_v57 = vsub.f32 0.0, %v673_v43 }
 0x6e9   : > { %v671_v50 = vand.u32 2147483647, %v1351_v45  ;;  %v728_v0 = vmul.f32 %v724_v56, %v672_v37  ;;  %vm663_vm10 = vcmp.ge.f32.partialorder %v1351_v45, 0.0 }
 0x6ea   : > { %1035 = vrcp.f32 %v680_v46  ;;  %v681_v51 = vadd.f32 1.0, %v677_v48  ;;  %v678_v52 = vmul.f32 0.3275911, %v674_v49  ;;  %v726_v58 = vsub.f32 0.0, %v674_v49 }
 0x6eb   : > { %v675_v44 = vmul.f32 0.70710677, %v671_v50  ;;  %v729_v60 = vmul.f32 %v725_v57, %v673_v43  ;;  %v732_v63 = vmul.f32 1.442695, %v728_v0  ;;  %v1155_v0 = vmov -1.0  }
 0x6ec   : > { %1037 = vrcp.f32 %v681_v51  ;;  %v682_v53 = vadd.f32 1.0, %v678_v52  ;;  %v730_v1 = vmul.f32 %v726_v58, %v674_v49  ;;  %v664_v58 = vsel %vm660_vm7, 1.0, %v1155_v0 }
 0x6ed   : > { %v679_v54 = vmul.f32 0.3275911, %v675_v44  ;;  %v727_v61 = vsub.f32 0.0, %v675_v44  ;;  %v734_v4 = vmul.f32 1.442695, %v729_v60 }
 0x6ee   : > { %1039 = vrcp.f32 %v682_v53  ;;  %v736_v9 = vmul.f32 1.442695, %v730_v1 }
 0x6ef   : > { %v683_v55 = vadd.f32 1.0, %v679_v54  ;;  %v731_v7 = vmul.f32 %v727_v61, %v675_v44  ;;  %v666_v61 = vsel %vm662_vm9, 1.0, %v1155_v0 }
 0x6f1   : > { %1041 = vrcp.f32 %v683_v55  ;;  %v738_v15 = vmul.f32 1.442695, %v731_v7 }
 0x6f2   : > { %1043 = vpow2.f32 %v732_v63 }
 0x6f3   : > { %1045 = vpow2.f32 %v734_v4  ;;  %v667_v4 = vsel %vm663_vm10, 1.0, %v1155_v0 }
 0x6f4   : > { %1047 = vpow2.f32 %v736_v9 }
 0x6f5   : > { %1049 = vpow2.f32 %v738_v15 }
 0x6f7   : > { %v1036_v59 = vpop.eup %1035 }
 0x6f8   : > { %v688_v62 = vmul.f32 1.0614054, %v1036_v59 }
 0x6f9   : > { %v1038_v2 = vpop.eup %1037 }
 0x6fa   : > { %v931_v3 = vadd.f32 -1.4531521, %v688_v62  ;;  %v689_v5 = vmul.f32 1.0614054, %v1038_v2 }
 0x6fb   : > { %v1040_v6 = vpop.eup %1039 }
 0x6fc   : > { %v696_v8 = vmul.f32 %v1036_v59, %v931_v3  ;;  %v932_v10 = vadd.f32 -1.4531521, %v689_v5  ;;  %v690_v11 = vmul.f32 1.0614054, %v1040_v6 }
 0x6fe   : > { %v700_v12 = vadd.f32 1.4214138, %v696_v8  ;;  %v1042_v13 = vpop.eup %1041  ;;  %v697_v14 = vmul.f32 %v1038_v2, %v932_v10  ;;  %v933_v24 = vadd.f32 -1.4531521, %v690_v11  ;;  %v754_v8 = vmul.f32 0.5, %v1348_v40 }
 0x6ff   : > { %v691_v16 = vmul.f32 1.0614054, %v1042_v13  ;;  %v1044_v41 = vpop.eup %1043  ;;  %v753_v10 = vmul.f32 0.5, %v1345_v34  ;;  %v755_v11 = vmul.f32 0.5, %v1351_v45  ;;  %v303_v40 = vld [vmem:[%s1405_s5] sm:$0x3]  ;;  %v769_v34 = vpop.permute.xlu1 %768 }
 0x700   : > { %v704_v17 = vmul.f32 %v1036_v59, %v700_v12  ;;  %v701_v18 = vadd.f32 1.4214138, %v697_v14  ;;  %v698_v19 = vmul.f32 %v1040_v6, %v933_v24  ;;  %v1046_v48 = vpop.eup %1045 }
 0x701   : > { %v934_v20 = vadd.f32 -1.4531521, %v691_v16  ;;  %v1048_v52 = vpop.eup %1047 }
 0x702   : > { %v935_v21 = vadd.f32 -0.28449672, %v704_v17  ;;  %v705_v22 = vmul.f32 %v1038_v2, %v701_v18  ;;  %v702_v23 = vadd.f32 1.4214138, %v698_v19  ;;  %v1050_v57 = vpop.eup %1049 }
 0x703   : > { %v699_v25 = vmul.f32 %v1042_v13, %v934_v20  ;;  %v819_v20 = vpop.permute.xlu1 %818 }
 0x704   : > { %v712_v26 = vmul.f32 %v1036_v59, %v935_v21  ;;  %v936_v27 = vadd.f32 -0.28449672, %v705_v22  ;;  %v706_v28 = vmul.f32 %v1040_v6, %v702_v23 }
 0x705   : > { %v703_v38 = vadd.f32 1.4214138, %v699_v25 }
 0x706   : > { %v716_v30 = vadd.f32 0.2548296, %v712_v26  ;;  %v713_v32 = vmul.f32 %v1038_v2, %v936_v27  ;;  %v937_v33 = vadd.f32 -0.28449672, %v706_v28 }
 0x707   : > { %v707_v35 = vmul.f32 %v1042_v13, %v703_v38 }
 0x708   : > { %v720_v36 = vmul.f32 %v1036_v59, %v716_v30  ;;  %v717_v37 = vadd.f32 0.2548296, %v713_v32  ;;  %v714_v39 = vmul.f32 %v1040_v6, %v937_v33  ;;  %v665_v59 = vsel %vm661_vm8, 1.0, %v1155_v0 }
 0x709   : > { %v938_v42 = vadd.f32 -0.28449672, %v707_v35 }
 0x70a   : > { %v721_v43 = vmul.f32 %v1038_v2, %v717_v37  ;;  %v718_v29 = vadd.f32 0.2548296, %v714_v39  ;;  %v740_v46 = vmul.f32 %v1044_v41, %v720_v36 }
 0x70b   : > { %v715_v49 = vmul.f32 %v1042_v13, %v938_v42 }
 0x70c   : > { %v741_v50 = vmul.f32 %v1046_v48, %v721_v43  ;;  %v722_v51 = vmul.f32 %v1040_v6, %v718_v29  ;;  %v744_v55 = vsub.f32 1.0, %v740_v46 }
 0x70d   : > { %v719_v44 = vadd.f32 0.2548296, %v715_v49 }
 0x70e   : > { %v745_v53 = vsub.f32 1.0, %v741_v50  ;;  %v742_v54 = vmul.f32 %v1048_v52, %v722_v51  ;;  %v748_v1 = vmul.f32 %v744_v55, %v664_v58 }
 0x70f   : > { %v723_v56 = vmul.f32 %v1042_v13, %v719_v44  ;;  %v752_v13 = vmul.f32 0.5, %v1342_v31 }
 0x710   : > { %v746_v60 = vsub.f32 1.0, %v742_v54  ;;  %v749_v63 = vmul.f32 %v745_v53, %v665_v59  ;;  %v756_v9 = vadd.f32 1.0, %v748_v1 }
 0x711   : > { %v743_v62 = vmul.f32 %v1050_v57, %v723_v56 }
 0x712   : > { %v750_v2 = vmul.f32 %v746_v60, %v666_v61  ;;  %v757_v7 = vadd.f32 1.0, %v749_v63  ;;  %v760_v16 = vmul.f32 %v756_v9, %v752_v13 }
 0x713   : > { %v747_v3 = vsub.f32 1.0, %v743_v62 }
 0x714   : > { %v758_v5 = vadd.f32 1.0, %v750_v2  ;;  %v761_v24 = vmul.f32 %v757_v7, %v753_v10 }
 0x715   : > { %v751_v6 = vmul.f32 %v747_v3, %v667_v4 }
 0x716   : > { %v762_v14 = vmul.f32 %v758_v5, %v754_v8 }
 0x717   : > { %v759_v12 = vadd.f32 1.0, %v751_v6 }
 0x718   : > { %v764_v18 = vpack.c.bf16 %v762_v14, %v760_v16 }
 0x719   : > { %v763_v15 = vmul.f32 %v759_v12, %v755_v11 }
 0x71b   : > { %v765_v17 = vpack.c.bf16 %v763_v15, %v761_v24 }
 0x71d   : > { %789 = vmatprep.subr.bf16.mxu1 %v765_v17 }
 0x71e   : > { %790 = vmatpush1.bf16.msra.mxu1 %v764_v18 }
 0x721   : > { %939 = vmatmul.mubr.msk.bf16.vlgmr.msra.gmra.mxu1 %vm771_vm11, %v303_v40 }
 0x7e1   : > { %v809_v45 = vpop.f32.mrf.mxu1 }
 0x7e2   : > { %v810_v31 = vadd.f32 %v809_v45, %v769_v34 }
 0x7e3   : > { %v811_v19 = vpop.f32.mrf.mxu1 }
 0x7e4   : > { %v812_v21 = vadd.f32 %v811_v19, %v769_v34  ;;  %v821_v23 = vmul.f32 %v819_v20, %v810_v31 }
 0x7e5   : > { %v813_v22 = vpop.f32.mrf.mxu1 }
 0x7e6   : > { %v822_v25 = vmul.f32 %v819_v20, %v812_v21 }
 0x7e7   : > { %v814_v26 = vpop.f32.mrf.mxu1 }
 0x7e8   : > { %v825_v27 = vcombine.low %v821_v23, %v822_v25 }
 0x7ea   : > { %v827_v28 = vadd.f32 %v825_v27, %v1314_v47 }
 0x7ec   : > { %828 = vst [vmem:[%s284_s13] sm:$0xff] %v827_v28 }
 0x7ed   : > { %1090 = shalt.err (!%p1087_p0)
}
 0x7ee   : > { %s1091_s22 = scalar_lea.hbm %s842_s17, 128  ;;  %s1095_s8 = scalar_lea.hbm %s1407_s7, 256 }
 0x7ef   : > { %p1092_p1 = scmp.ne.s32.totalorder %s842_s17, %s1091_s22  ;;  %p1096_p4 = scmp.lt.s32.totalorder %s842_s17, %s1407_s7 }
 0x7f0   : > { %p1097_p7 = scmp.lt.s32.totalorder %s1095_s8, %s1091_s22 }
 0x7f1   : > { %p1093_p2 = pnand %p1092_p1, %p1235_p5 }
 0x7f2   : > { %p1098_p8 = por %p1097_p7, %p1096_p4 }
 0x7f3   : > { %p1094_p3 = pneg %p1093_p2 }
 0x7f5   : > { %p1099_p6 = pnand %p1098_p8, %p1094_p3 }
 0x7f7   : > { %1102 = shalt.err (!%p1099_p6)
}
 0x7f8   : > { %963 = dma.vmem_to_hbm [thread:$0]  (%p1235_p5), %s845_s14, 128, %s842_s17, %s830_s18  }
 0x7f9 PF: > { %p975_p9 = scmp.ge.s32.totalorder %s1141_s27, 2  ;;  %s856_s15 = sand.u32 1, %s1129_s24  }
 0x7fa   : > { %p1411_p10 = scmp.ne.s32.totalorder %s1409_s12, 0  ;;  %s857_s16 = scalar_lea.sflag [#allocation5], %s856_s15 }
 0x7fc   : > { %p970_p11 = pnand %p975_p9, %p1411_p10 }
 0x7fe   : > { %p971_p12 = pneg %p970_p11 }
 0x800   : > { %1124 = dma.done.wait (%p971_p12), %s857_s16, 128  }
 0x801   : > { %1126 = vsyncadd (%p971_p12), %s857_s16, 4294967168  ;;  %p18_p13 = scmp.ge.s32.totalorder %s1222_s30, 4   ;;  %s1412_s24 = smov %s1133_s25 }
 0x802   : > { %s1413_s25 = smov %s1137_s26  ;;  %s1414_s26 = smov %s1233_s10 }
 0x803   : > { %s1415_s27 = smov %s1222_s30  ;;  %20 = sbr.rel (!%p18_p13) target bundleno = 4 (0x4), region = 92 }
 0x808   :  { %862 = vsyncpa [#allocation4], 1 }
 0x809   :  { %864 = vsyncpa [#allocation4 + $0x1], 1 }
 0x80a   :  { %865 = vsyncpa [#allocation5], 1 }
 0x80b   :  { %867 = vsyncpa [#allocation5 + $0x1], 1 }

</bundles_post_ra>
